<compile_context>
chip_gen: v6e
topology: v6e:2x2x1
jax: 0.10.0
libtpu: 0.0.40
codegen_flags: <defaults>
</compile_context>

<pallas_src>
import jax
import jax.numpy as jnp
from jax.experimental import pallas as pl
from jax.experimental.pallas import tpu as pltpu


NEG_SLOPE = 0.15
_BF16, _F32 = 2, 4  # bytes


def _leaky_relu(x):
    return jnp.where(x > 0, x, NEG_SLOPE * x)


# -----------------------------------------------------------------------------
# Kernel
# -----------------------------------------------------------------------------
def simple_nn_kernel(x_ref, w1_ref, b1_ref, w2_ref, b2_ref, w3_ref, b3_ref,
                     o_ref, h2_ref):
    # Grid = (batch tile i ["parallel"], vocab tile j ["arbitrary", innermost]).
    # h2 is computed once per batch tile (at j == 0), cached in VMEM scratch and
    # reused for every vocab tile of fc3.
    # NOTE: this caching is only correct while the vocab axis stays innermost
    # and "arbitrary" -- do not mark it parallel/core_parallel or reorder the
    # grid without restructuring.
    @pl.when(pl.program_id(1) == 0)
    def _():
        x = _leaky_relu(x_ref[...])                                 # relu1 (f32)
        h1 = jnp.dot(x.astype(jnp.bfloat16), w1_ref[...],
                     preferred_element_type=jnp.float32) + b1_ref[...]
        h1 = _leaky_relu(h1)                                        # relu2 (f32)
        h2 = jnp.dot(h1.astype(jnp.bfloat16), w2_ref[...],
                     preferred_element_type=jnp.float32) + b2_ref[...]
        h2_ref[...] = _leaky_relu(h2).astype(jnp.bfloat16)          # relu3 (f32)

    out = jnp.dot(h2_ref[...], w3_ref[...],
                  preferred_element_type=jnp.float32) + b3_ref[...]
    o_ref[...] = out.astype(o_ref.dtype)


# -----------------------------------------------------------------------------
# Layout / tiling helpers
# -----------------------------------------------------------------------------
def _round_up(x, m):
    return (x + m - 1) // m * m


def _pad_to(a, axis, target):
    pad = target - a.shape[axis]
    if pad == 0:
        return a
    widths = [(0, 0)] * a.ndim
    widths[axis] = (0, pad)
    return jnp.pad(a, widths)


def _vmem_capacity_bytes():
    try:
        return int(pltpu.get_tpu_info().vmem_capacity_bytes)
    except Exception:
        return 64 * 1024 * 1024   # conservative floor: v7x per-TensorCore VMEM


def _footprint_bytes(tb, tv, Hp, in_feat_p, resident_bufs=2):
    """Per-step VMEM footprint of all blocks (conservative: residents x bufs)."""
    residents = resident_bufs * ((in_feat_p * Hp + Hp * Hp) * _BF16   # w1, w2 bf16
                                 + 2 * Hp * _F32)                     # b1, b2 f32
    streams = (2 * tb * in_feat_p * _F32                              # x (2-buf)
               + 2 * (Hp * tv * _BF16 + tv * _F32)                    # w3, b3 (2-buf)
               + 2 * tb * tv * _F32)                                  # out (2-buf)
    scratch = tb * Hp * _BF16                                         # cached h2
    return residents + streams + scratch


def _pick_vocab_tile(V, tb, Hp, in_feat_p, budget):
    v128 = _round_up(V, 128)
    for tv in (2048, 1024, 512, 256, 128):                # 256-multiples first
        if tv > v128:
            continue
        if _footprint_bytes(tb, tv, Hp, in_feat_p) <= budget:
            return tv
    return 128


# -----------------------------------------------------------------------------
# Forward wrapper
# -----------------------------------------------------------------------------
def simple_nn_forward(token_ids, params, *, batch_tile=None, vocab_tile=None):
    """SimpleNN forward.

    token_ids: int32 [B, W]
    params: emb [V, E], w1 [W*E, H], b1 [1, H], w2 [H, H], b2 [1, H],
            w3 [H, V], b3 [1, V]   (linear weights stored as [in, out])
    """
    emb = params["emb"]
    w1, b1 = params["w1"], params["b1"]
    w2, b2 = params["w2"], params["b2"]
    w3, b3 = params["w3"], params["b3"]

    B, W = token_ids.shape
    V, E = emb.shape
    H = w1.shape[1]
    in_feat = W * E

    # Embedding gather + flatten: data-dependent per-token lookup stays as
    # plain-JAX glue (a per-row in-kernel DMA of E floats does not pay off).
    # relu1 is applied INSIDE the kernel on the (tb, in_feat) tile.
    x = jnp.take(emb, token_ids, axis=0).reshape(B, in_feat)

    # ---- MXU / lane alignment (exact zero padding) ---------------------------
    in_feat_p = _round_up(in_feat, 128)     # fc1 K dimension, lane-dense x tile
    Hp = _round_up(H, 256)                  # full 256-wide MXU passes (v6e/v7x)

    # ---- Tiling against the chip's VMEM budget -------------------------------
    vmem_cap = _vmem_capacity_bytes()
    budget = int(vmem_cap * 0.70)

    B8 = _round_up(B, 8)
    if batch_tile is None:
        # Prefer ONE big batch tile (w3 streamed from HBM once), cap ~512 rows.
        n_bt = -(-B8 // 512)
        batch_tile = _round_up(-(-B8 // n_bt), 8)
    tb = batch_tile
    assert tb % 8 == 0, tb
    Bp = _round_up(B8, tb)

    if vocab_tile is None:
        vocab_tile = _pick_vocab_tile(V, tb, Hp, in_feat_p, budget)
    tv = vocab_tile
    assert tv % 128 == 0, tv
    Vp = _round_up(V, tv)

    nb, nv = Bp // tb, Vp // tv

    # ---- One-time layout prep (outside the hot kernel) -----------------------
    x_p = _pad_to(_pad_to(x, 0, Bp), 1, in_feat_p).astype(jnp.float32)
    w1p = _pad_to(_pad_to(w1, 0, in_feat_p), 1, Hp).astype(jnp.bfloat16)
    b1p = _pad_to(b1, 1, Hp).astype(jnp.float32)
    w2p = _pad_to(_pad_to(w2, 0, Hp), 1, Hp).astype(jnp.bfloat16)
    b2p = _pad_to(b2, 1, Hp).astype(jnp.float32)
    w3p = _pad_to(_pad_to(w3, 0, Hp), 1, Vp).astype(jnp.bfloat16)
    b3p = _pad_to(b3, 1, Vp).astype(jnp.float32)

    # ---- Cost hint for XLA's scheduler (w3/b3 counted once per batch tile) ---
    flops = 2 * Bp * (in_feat_p * Hp + Hp * Hp) + 2 * Bp * Hp * Vp
    bytes_accessed = (Bp * in_feat_p * _F32                       # x
                      + (in_feat_p * Hp + Hp * Hp) * _BF16        # w1, w2 (resident)
                      + 2 * Hp * _F32                             # b1, b2
                      + nb * (Hp * Vp * _BF16 + Vp * _F32)        # w3, b3 per batch tile
                      + Bp * Vp * _F32)                           # output
    cost = pl.CostEstimate(flops=int(flops), transcendentals=0,
                           bytes_accessed=int(bytes_accessed))

    # ---- Explicit VMEM limit from actual block footprint ---------------------
    footprint = _footprint_bytes(tb, tv, Hp, in_feat_p, resident_bufs=2)
    vmem_limit = max(32 << 20, 2 * footprint + (4 << 20))
    vmem_limit = min(vmem_limit, int(vmem_cap * 0.75))
    vmem_limit = max(vmem_limit, footprint + (2 << 20))

    def run(resident_mode):
        def rspec(shape):
            kwargs = {}
            if resident_mode is not None:
                kwargs["pipeline_mode"] = resident_mode
            return pl.BlockSpec(shape, lambda i, j: (0, 0), **kwargs)

        grid_spec = pltpu.PrefetchScalarGridSpec(
            num_scalar_prefetch=0,
            grid=(nb, nv),
            in_specs=[
                pl.BlockSpec((tb, in_feat_p), lambda i, j: (i, 0)),  # x batch tile
                rspec((in_feat_p, Hp)),                              # w1 (resident)
                rspec((1, Hp)),                                      # b1 (resident)
                rspec((Hp, Hp)),                                     # w2 (resident)
                rspec((1, Hp)),                                      # b2 (resident)
                pl.BlockSpec((Hp, tv), lambda i, j: (0, j)),         # w3 vocab tile
                pl.BlockSpec((1, tv), lambda i, j: (0, j)),          # b3 vocab tile
            ],
            out_specs=pl.BlockSpec((tb, tv), lambda i, j: (i, j)),
            scratch_shapes=[pltpu.VMEM((tb, Hp), jnp.bfloat16)],     # cached h2
        )
        out_full = pl.pallas_call(
            simple_nn_kernel,
            out_shape=jax.ShapeDtypeStruct((Bp, Vp), jnp.float32),
            grid_spec=grid_spec,
            compiler_params=pltpu.CompilerParams(
                dimension_semantics=("parallel", "arbitrary"),
                vmem_limit_bytes=int(vmem_limit),
            ),
            cost_estimate=cost,
        )(x_p, w1p, b1p, w2p, b2p, w3p, b3p)
        return out_full

    try:
        # Single-buffer the never-changing resident weight blocks.
        out_full = jax.block_until_ready(run(pl.Buffered(1)))
    except Exception:
        # This Pallas build rejected buffer_count=1 -> fall back to the default
        # double-buffered residents (correctness unaffected, only VMEM waste).
        out_full = run(None)

    return out_full[:B, :V]


# -----------------------------------------------------------------------------
# Parameters and references
# -----------------------------------------------------------------------------
def init_params(key, vocab_size, embedding_dim, hidden_dim, window_size):
    """Deterministic synthetic parameters matching the PyTorch module's shapes."""
    ks = jax.random.split(key, 7)
    in_feat = embedding_dim * window_size

    def uniform_fan_in(k, shape, fan_in):
        bound = 1.0 / jnp.sqrt(jnp.float32(fan_in))
        return jax.random.uniform(k, shape, jnp.float32, -bound, bound)

    return {
        # nn.Embedding default init ~ N(0, 1)
        "emb": jax.random.normal(ks[0], (vocab_size, embedding_dim), jnp.float32),
        # nn.Linear default init ~ U(-1/sqrt(fan_in), 1/sqrt(fan_in)); stored [in, out]
        "w1": uniform_fan_in(ks[1], (in_feat, hidden_dim), in_feat),
        "b1": uniform_fan_in(ks[2], (1, hidden_dim), in_feat),
        "w2": uniform_fan_in(ks[3], (hidden_dim, hidden_dim), hidden_dim),
        "b2": uniform_fan_in(ks[4], (1, hidden_dim), hidden_dim),
        "w3": uniform_fan_in(ks[5], (hidden_dim, vocab_size), hidden_dim),
        "b3": uniform_fan_in(ks[6], (1, vocab_size), hidden_dim),
    }


def reference_forward(token_ids, params):
    """Pure-JAX f32 reference (mirrors the PyTorch forward exactly)."""
    B, _ = token_ids.shape
    x = jnp.take(params["emb"], token_ids, axis=0)          # [B, W, E]
    x = _leaky_relu(x)                                       # relu1
    x = x.reshape(B, -1)                                     # flatten
    x = _leaky_relu(x @ params["w1"] + params["b1"])         # fc1 + relu2
    x = _leaky_relu(x @ params["w2"] + params["b2"])         # fc2 + relu3
    return x @ params["w3"] + params["b3"]                   # fc3


def reference_forward_bf16(token_ids, params):
    """Precision-matched reference (bf16 weights/operands, f32 accumulation)."""
    bf16, f32 = jnp.bfloat16, jnp.float32
    B, _ = token_ids.shape
    x = _leaky_relu(jnp.take(params["emb"], token_ids, axis=0).reshape(B, -1))
    h1 = _leaky_relu(jnp.dot(x.astype(bf16), params["w1"].astype(bf16),
                             preferred_element_type=f32) + params["b1"])
    h2 = _leaky_relu(jnp.dot(h1.astype(bf16), params["w2"].astype(bf16),
                             preferred_element_type=f32) + params["b2"])
    return jnp.dot(h2.astype(bf16), params["w3"].astype(bf16),
                   preferred_element_type=f32) + params["b3"]


if __name__ == "__main__":
    # Small shapes consistent with the module's forward.
    VOCAB = 512
    EMB = 16
    HIDDEN = 32
    WINDOW = 8
    BATCH = 64

    key = jax.random.PRNGKey(0)
    k_params, k_ids = jax.random.split(key)

    params = init_params(k_params, VOCAB, EMB, HIDDEN, WINDOW)
    token_ids = jax.random.randint(k_ids, (BATCH, WINDOW), 0, VOCAB, dtype=jnp.int32)

    ref_f32 = reference_forward(token_ids, params)
    ref_bf16 = reference_forward_bf16(token_ids, params)

    # Default tiling (single batch/vocab tile at these toy sizes).
    out = jax.block_until_ready(simple_nn_forward(token_ids, params))
    # Explicit small tiles -> 2x2 grid; exercises the cached-h2 / streamed-w3 path.
    out_tiled = jax.block_until_ready(
        simple_nn_forward(token_ids, params, batch_tile=32, vocab_tile=256))

    for o in (out, out_tiled):
        assert o.shape == (BATCH, VOCAB), o.shape
        err_matched = float(jnp.max(jnp.abs(o - ref_bf16)))
        err_f32 = float(jnp.max(jnp.abs(o - ref_f32)))
        assert err_matched < 5e-3, f"mismatch vs precision-matched ref: {err_matched}"
        assert err_f32 < 5e-2, f"mismatch vs f32 reference: {err_f32}"

    print("KERNEL_OK")
</pallas_src>

<mosaic_0001>
module attributes {stable_mosaic.version = 11 : i64} {
  func.func @simple_nn_kernel(%arg0: i32, %arg1: i32, %arg2: memref<64x128xf32, #tpu.memory_space<vmem>>, %arg3: memref<128x256xbf16, #tpu.memory_space<vmem>>, %arg4: memref<1x256xf32, #tpu.memory_space<vmem>>, %arg5: memref<256x256xbf16, #tpu.memory_space<vmem>>, %arg6: memref<1x256xf32, #tpu.memory_space<vmem>>, %arg7: memref<256x512xbf16, #tpu.memory_space<vmem>>, %arg8: memref<1x512xf32, #tpu.memory_space<vmem>>, %arg9: memref<64x512xf32, #tpu.memory_space<vmem>>, %arg10: memref<64x256xbf16, #tpu.memory_space<vmem>>) attributes {dimension_semantics = [#tpu.dimension_semantics<parallel>, #tpu.dimension_semantics<arbitrary>], iteration_bounds = array<i64: 1, 1>, scalar_prefetch = 0 : i64, scratch_operands = 1 : i64, tpu.core_type = #tpu.core_type<tc>, window_params = [{transform_indices = @transform_0, window_bounds = array<i64: 64, 128>}, {pipeline_mode = #tpu.pipeline_mode<synchronous>, transform_indices = @transform_1, window_bounds = array<i64: 128, 256>}, {pipeline_mode = #tpu.pipeline_mode<synchronous>, transform_indices = @transform_2, window_bounds = array<i64: 1, 256>}, {pipeline_mode = #tpu.pipeline_mode<synchronous>, transform_indices = @transform_3, window_bounds = array<i64: 256, 256>}, {pipeline_mode = #tpu.pipeline_mode<synchronous>, transform_indices = @transform_4, window_bounds = array<i64: 1, 256>}, {transform_indices = @transform_5, window_bounds = array<i64: 256, 512>}, {transform_indices = @transform_6, window_bounds = array<i64: 1, 512>}, {transform_indices = @transform_7, window_bounds = array<i64: 64, 512>}]} {
    %c0_i32 = arith.constant 0 : i32
    %0 = arith.cmpi eq, %arg1, %c0_i32 : i32
    %1 = arith.extui %0 : i1 to i32
    %c0_i32_0 = arith.constant 0 : i32
    %2 = arith.cmpi ne, %1, %c0_i32_0 : i32
    scf.if %2 {
      %c0_8 = arith.constant 0 : index
      %c0_9 = arith.constant 0 : index
      %10 = vector.load %arg2[%c0_8, %c0_9] : memref<64x128xf32, #tpu.memory_space<vmem>>, vector<64x128xf32>
      %cst_10 = arith.constant 0.000000e+00 : f32
      %11 = vector.broadcast %cst_10 : f32 to vector<64x128xf32>
      %12 = arith.cmpf ogt, %10, %11 : vector<64x128xf32>
      %cst_11 = arith.constant 1.500000e-01 : f32
      %13 = vector.broadcast %cst_11 : f32 to vector<64x128xf32>
      %14 = arith.mulf %13, %10 : vector<64x128xf32>
      %15 = arith.select %12, %10, %14 : vector<64x128xi1>, vector<64x128xf32>
      %16 = arith.truncf %15 : vector<64x128xf32> to vector<64x128xbf16>
      %c0_12 = arith.constant 0 : index
      %c0_13 = arith.constant 0 : index
      %17 = vector.load %arg3[%c0_12, %c0_13] : memref<128x256xbf16, #tpu.memory_space<vmem>>, vector<128x256xbf16>
      %cst_14 = arith.constant dense<0.000000e+00> : vector<64x256xf32>
      %18 = tpu.matmul %16, %17, %cst_14 {dimension_numbers = #tpu.dot_dimension_numbers<[1], [0], [0], [1], [0, 0, 1, 1], [], []>} : vector<64x128xbf16>, vector<128x256xbf16>, vector<64x256xf32> -> vector<64x256xf32>
      %c0_15 = arith.constant 0 : index
      %c0_16 = arith.constant 0 : index
      %19 = vector.load %arg4[%c0_15, %c0_16] : memref<1x256xf32, #tpu.memory_space<vmem>>, vector<1x256xf32>
      %20 = vector.broadcast %19 : vector<1x256xf32> to vector<64x256xf32>
      %21 = arith.addf %18, %20 : vector<64x256xf32>
      %cst_17 = arith.constant 0.000000e+00 : f32
      %22 = vector.broadcast %cst_17 : f32 to vector<64x256xf32>
      %23 = arith.cmpf ogt, %21, %22 : vector<64x256xf32>
      %cst_18 = arith.constant 1.500000e-01 : f32
      %24 = vector.broadcast %cst_18 : f32 to vector<64x256xf32>
      %25 = arith.mulf %24, %21 : vector<64x256xf32>
      %26 = arith.select %23, %21, %25 : vector<64x256xi1>, vector<64x256xf32>
      %27 = arith.truncf %26 : vector<64x256xf32> to vector<64x256xbf16>
      %c0_19 = arith.constant 0 : index
      %c0_20 = arith.constant 0 : index
      %28 = vector.load %arg5[%c0_19, %c0_20] : memref<256x256xbf16, #tpu.memory_space<vmem>>, vector<256x256xbf16>
      %cst_21 = arith.constant dense<0.000000e+00> : vector<64x256xf32>
      %29 = tpu.matmul %27, %28, %cst_21 {dimension_numbers = #tpu.dot_dimension_numbers<[1], [0], [0], [1], [0, 0, 1, 1], [], []>} : vector<64x256xbf16>, vector<256x256xbf16>, vector<64x256xf32> -> vector<64x256xf32>
      %c0_22 = arith.constant 0 : index
      %c0_23 = arith.constant 0 : index
      %30 = vector.load %arg6[%c0_22, %c0_23] : memref<1x256xf32, #tpu.memory_space<vmem>>, vector<1x256xf32>
      %31 = vector.broadcast %30 : vector<1x256xf32> to vector<64x256xf32>
      %32 = arith.addf %29, %31 : vector<64x256xf32>
      %cst_24 = arith.constant 0.000000e+00 : f32
      %33 = vector.broadcast %cst_24 : f32 to vector<64x256xf32>
      %34 = arith.cmpf ogt, %32, %33 : vector<64x256xf32>
      %cst_25 = arith.constant 1.500000e-01 : f32
      %35 = vector.broadcast %cst_25 : f32 to vector<64x256xf32>
      %36 = arith.mulf %35, %32 : vector<64x256xf32>
      %37 = arith.select %34, %32, %36 : vector<64x256xi1>, vector<64x256xf32>
      %38 = arith.truncf %37 : vector<64x256xf32> to vector<64x256xbf16>
      %c0_26 = arith.constant 0 : index
      %c0_27 = arith.constant 0 : index
      %39 = vector.load %arg10[%c0_26, %c0_27] : memref<64x256xbf16, #tpu.memory_space<vmem>>, vector<64x256xbf16>
      tpu.vector_store %arg10[%c0_26, %c0_27], %38 {strides = array<i32>} : memref<64x256xbf16, #tpu.memory_space<vmem>>, vector<64x256xbf16>,
    } else {
    }
    %c0 = arith.constant 0 : index
    %c0_1 = arith.constant 0 : index
    %3 = vector.load %arg10[%c0, %c0_1] : memref<64x256xbf16, #tpu.memory_space<vmem>>, vector<64x256xbf16>
    %c0_2 = arith.constant 0 : index
    %c0_3 = arith.constant 0 : index
    %4 = vector.load %arg7[%c0_2, %c0_3] : memref<256x512xbf16, #tpu.memory_space<vmem>>, vector<256x512xbf16>
    %cst = arith.constant dense<0.000000e+00> : vector<64x512xf32>
    %5 = tpu.matmul %3, %4, %cst {dimension_numbers = #tpu.dot_dimension_numbers<[1], [0], [0], [1], [0, 0, 1, 1], [], []>} : vector<64x256xbf16>, vector<256x512xbf16>, vector<64x512xf32> -> vector<64x512xf32>
    %c0_4 = arith.constant 0 : index
    %c0_5 = arith.constant 0 : index
    %6 = vector.load %arg8[%c0_4, %c0_5] : memref<1x512xf32, #tpu.memory_space<vmem>>, vector<1x512xf32>
    %7 = vector.broadcast %6 : vector<1x512xf32> to vector<64x512xf32>
    %8 = arith.addf %5, %7 : vector<64x512xf32>
    %c0_6 = arith.constant 0 : index
    %c0_7 = arith.constant 0 : index
    %9 = vector.load %arg9[%c0_6, %c0_7] : memref<64x512xf32, #tpu.memory_space<vmem>>, vector<64x512xf32>
    tpu.vector_store %arg9[%c0_6, %c0_7], %8 {strides = array<i32>} : memref<64x512xf32, #tpu.memory_space<vmem>>, vector<64x512xf32>,
    return
  }
  func.func @transform_0(%arg0: i32, %arg1: i32) -> (i32, i32) {
    %c0_i32 = arith.constant 0 : i32
    %c0_i32_0 = arith.constant 0 : i32
    return %arg0, %c0_i32 : i32, i32
  }
  func.func @transform_1(%arg0: i32, %arg1: i32) -> (i32, i32) {
    %c0_i32 = arith.constant 0 : i32
    %c0_i32_0 = arith.constant 0 : i32
    %c0_i32_1 = arith.constant 0 : i32
    return %c0_i32, %c0_i32_0 : i32, i32
  }
  func.func @transform_2(%arg0: i32, %arg1: i32) -> (i32, i32) {
    %c0_i32 = arith.constant 0 : i32
    %c0_i32_0 = arith.constant 0 : i32
    %c0_i32_1 = arith.constant 0 : i32
    return %c0_i32, %c0_i32_0 : i32, i32
  }
  func.func @transform_3(%arg0: i32, %arg1: i32) -> (i32, i32) {
    %c0_i32 = arith.constant 0 : i32
    %c0_i32_0 = arith.constant 0 : i32
    %c0_i32_1 = arith.constant 0 : i32
    return %c0_i32, %c0_i32_0 : i32, i32
  }
  func.func @transform_4(%arg0: i32, %arg1: i32) -> (i32, i32) {
    %c0_i32 = arith.constant 0 : i32
    %c0_i32_0 = arith.constant 0 : i32
    %c0_i32_1 = arith.constant 0 : i32
    return %c0_i32, %c0_i32_0 : i32, i32
  }
  func.func @transform_5(%arg0: i32, %arg1: i32) -> (i32, i32) {
    %c0_i32 = arith.constant 0 : i32
    %c0_i32_0 = arith.constant 0 : i32
    return %c0_i32, %arg1 : i32, i32
  }
  func.func @transform_6(%arg0: i32, %arg1: i32) -> (i32, i32) {
    %c0_i32 = arith.constant 0 : i32
    %c0_i32_0 = arith.constant 0 : i32
    return %c0_i32, %arg1 : i32, i32
  }
  func.func @transform_7(%arg0: i32, %arg1: i32) -> (i32, i32) {
    %c0_i32 = arith.constant 0 : i32
    return %arg0, %arg1 : i32, i32
  }
}

module attributes {stable_mosaic.version = 11 : i64} {
  func.func @simple_nn_kernel(%arg0: i32, %arg1: i32, %arg2: memref<64x128xf32, #tpu.memory_space<vmem>>, %arg3: memref<128x256xbf16, #tpu.memory_space<vmem>>, %arg4: memref<1x256xf32, #tpu.memory_space<vmem>>, %arg5: memref<256x256xbf16, #tpu.memory_space<vmem>>, %arg6: memref<1x256xf32, #tpu.memory_space<vmem>>, %arg7: memref<256x512xbf16, #tpu.memory_space<vmem>>, %arg8: memref<1x512xf32, #tpu.memory_space<vmem>>, %arg9: memref<64x512xf32, #tpu.memory_space<vmem>>, %arg10: memref<64x256xbf16, #tpu.memory_space<vmem>>) attributes {dimension_semantics = [#tpu.dimension_semantics<parallel>, #tpu.dimension_semantics<arbitrary>], iteration_bounds = array<i64: 1, 1>, scalar_prefetch = 0 : i64, scratch_operands = 1 : i64, tpu.core_type = #tpu.core_type<tc>, window_params = [{transform_indices = @transform_0, window_bounds = array<i64: 64, 128>}, {pipeline_mode = #tpu.pipeline_mode<synchronous>, transform_indices = @transform_1, window_bounds = array<i64: 128, 256>}, {pipeline_mode = #tpu.pipeline_mode<synchronous>, transform_indices = @transform_2, window_bounds = array<i64: 1, 256>}, {pipeline_mode = #tpu.pipeline_mode<synchronous>, transform_indices = @transform_3, window_bounds = array<i64: 256, 256>}, {pipeline_mode = #tpu.pipeline_mode<synchronous>, transform_indices = @transform_4, window_bounds = array<i64: 1, 256>}, {transform_indices = @transform_5, window_bounds = array<i64: 256, 512>}, {transform_indices = @transform_6, window_bounds = array<i64: 1, 512>}, {transform_indices = @transform_7, window_bounds = array<i64: 64, 512>}]} {
    %c0_i32 = arith.constant 0 : i32
    %0 = arith.cmpi eq, %arg1, %c0_i32 : i32
    %1 = arith.extui %0 : i1 to i32
    %c0_i32_0 = arith.constant 0 : i32
    %2 = arith.cmpi ne, %1, %c0_i32_0 : i32
    scf.if %2 {
      %c0_8 = arith.constant 0 : index
      %c0_9 = arith.constant 0 : index
      %10 = vector.load %arg2[%c0_8, %c0_9] : memref<64x128xf32, #tpu.memory_space<vmem>>, vector<64x128xf32>
      %cst_10 = arith.constant 0.000000e+00 : f32
      %11 = vector.broadcast %cst_10 : f32 to vector<64x128xf32>
      %12 = arith.cmpf ogt, %10, %11 : vector<64x128xf32>
      %cst_11 = arith.constant 1.500000e-01 : f32
      %13 = vector.broadcast %cst_11 : f32 to vector<64x128xf32>
      %14 = arith.mulf %13, %10 : vector<64x128xf32>
      %15 = arith.select %12, %10, %14 : vector<64x128xi1>, vector<64x128xf32>
      %16 = arith.truncf %15 : vector<64x128xf32> to vector<64x128xbf16>
      %c0_12 = arith.constant 0 : index
      %c0_13 = arith.constant 0 : index
      %17 = vector.load %arg3[%c0_12, %c0_13] : memref<128x256xbf16, #tpu.memory_space<vmem>>, vector<128x256xbf16>
      %cst_14 = arith.constant dense<0.000000e+00> : vector<64x256xf32>
      %18 = tpu.matmul %16, %17, %cst_14 {dimension_numbers = #tpu.dot_dimension_numbers<[1], [0], [0], [1], [0, 0, 1, 1], [], []>} : vector<64x128xbf16>, vector<128x256xbf16>, vector<64x256xf32> -> vector<64x256xf32>
      %c0_15 = arith.constant 0 : index
      %c0_16 = arith.constant 0 : index
      %19 = vector.load %arg4[%c0_15, %c0_16] : memref<1x256xf32, #tpu.memory_space<vmem>>, vector<1x256xf32>
      %20 = vector.broadcast %19 : vector<1x256xf32> to vector<64x256xf32>
      %21 = arith.addf %18, %20 : vector<64x256xf32>
      %cst_17 = arith.constant 0.000000e+00 : f32
      %22 = vector.broadcast %cst_17 : f32 to vector<64x256xf32>
      %23 = arith.cmpf ogt, %21, %22 : vector<64x256xf32>
      %cst_18 = arith.constant 1.500000e-01 : f32
      %24 = vector.broadcast %cst_18 : f32 to vector<64x256xf32>
      %25 = arith.mulf %24, %21 : vector<64x256xf32>
      %26 = arith.select %23, %21, %25 : vector<64x256xi1>, vector<64x256xf32>
      %27 = arith.truncf %26 : vector<64x256xf32> to vector<64x256xbf16>
      %c0_19 = arith.constant 0 : index
      %c0_20 = arith.constant 0 : index
      %28 = vector.load %arg5[%c0_19, %c0_20] : memref<256x256xbf16, #tpu.memory_space<vmem>>, vector<256x256xbf16>
      %cst_21 = arith.constant dense<0.000000e+00> : vector<64x256xf32>
      %29 = tpu.matmul %27, %28, %cst_21 {dimension_numbers = #tpu.dot_dimension_numbers<[1], [0], [0], [1], [0, 0, 1, 1], [], []>} : vector<64x256xbf16>, vector<256x256xbf16>, vector<64x256xf32> -> vector<64x256xf32>
      %c0_22 = arith.constant 0 : index
      %c0_23 = arith.constant 0 : index
      %30 = vector.load %arg6[%c0_22, %c0_23] : memref<1x256xf32, #tpu.memory_space<vmem>>, vector<1x256xf32>
      %31 = vector.broadcast %30 : vector<1x256xf32> to vector<64x256xf32>
      %32 = arith.addf %29, %31 : vector<64x256xf32>
      %cst_24 = arith.constant 0.000000e+00 : f32
      %33 = vector.broadcast %cst_24 : f32 to vector<64x256xf32>
      %34 = arith.cmpf ogt, %32, %33 : vector<64x256xf32>
      %cst_25 = arith.constant 1.500000e-01 : f32
      %35 = vector.broadcast %cst_25 : f32 to vector<64x256xf32>
      %36 = arith.mulf %35, %32 : vector<64x256xf32>
      %37 = arith.select %34, %32, %36 : vector<64x256xi1>, vector<64x256xf32>
      %38 = arith.truncf %37 : vector<64x256xf32> to vector<64x256xbf16>
      %c0_26 = arith.constant 0 : index
      %c0_27 = arith.constant 0 : index
      %39 = vector.load %arg10[%c0_26, %c0_27] : memref<64x256xbf16, #tpu.memory_space<vmem>>, vector<64x256xbf16>
      tpu.vector_store %arg10[%c0_26, %c0_27], %38 {strides = array<i32>} : memref<64x256xbf16, #tpu.memory_space<vmem>>, vector<64x256xbf16>,
    } else {
    }
    %c0 = arith.constant 0 : index
    %c0_1 = arith.constant 0 : index
    %3 = vector.load %arg10[%c0, %c0_1] : memref<64x256xbf16, #tpu.memory_space<vmem>>, vector<64x256xbf16>
    %c0_2 = arith.constant 0 : index
    %c0_3 = arith.constant 0 : index
    %4 = vector.load %arg7[%c0_2, %c0_3] : memref<256x512xbf16, #tpu.memory_space<vmem>>, vector<256x512xbf16>
    %cst = arith.constant dense<0.000000e+00> : vector<64x512xf32>
    %5 = tpu.matmul %3, %4, %cst {dimension_numbers = #tpu.dot_dimension_numbers<[1], [0], [0], [1], [0, 0, 1, 1], [], []>} : vector<64x256xbf16>, vector<256x512xbf16>, vector<64x512xf32> -> vector<64x512xf32>
    %c0_4 = arith.constant 0 : index
    %c0_5 = arith.constant 0 : index
    %6 = vector.load %arg8[%c0_4, %c0_5] : memref<1x512xf32, #tpu.memory_space<vmem>>, vector<1x512xf32>
    %7 = vector.broadcast %6 : vector<1x512xf32> to vector<64x512xf32>
    %8 = arith.addf %5, %7 : vector<64x512xf32>
    %c0_6 = arith.constant 0 : index
    %c0_7 = arith.constant 0 : index
    %9 = vector.load %arg9[%c0_6, %c0_7] : memref<64x512xf32, #tpu.memory_space<vmem>>, vector<64x512xf32>
    tpu.vector_store %arg9[%c0_6, %c0_7], %8 {strides = array<i32>} : memref<64x512xf32, #tpu.memory_space<vmem>>, vector<64x512xf32>,
    return
  }
  func.func @transform_0(%arg0: i32, %arg1: i32) -> (i32, i32) {
    %c0_i32 = arith.constant 0 : i32
    %c0_i32_0 = arith.constant 0 : i32
    return %arg0, %c0_i32 : i32, i32
  }
  func.func @transform_1(%arg0: i32, %arg1: i32) -> (i32, i32) {
    %c0_i32 = arith.constant 0 : i32
    %c0_i32_0 = arith.constant 0 : i32
    %c0_i32_1 = arith.constant 0 : i32
    return %c0_i32, %c0_i32_0 : i32, i32
  }
  func.func @transform_2(%arg0: i32, %arg1: i32) -> (i32, i32) {
    %c0_i32 = arith.constant 0 : i32
    %c0_i32_0 = arith.constant 0 : i32
    %c0_i32_1 = arith.constant 0 : i32
    return %c0_i32, %c0_i32_0 : i32, i32
  }
  func.func @transform_3(%arg0: i32, %arg1: i32) -> (i32, i32) {
    %c0_i32 = arith.constant 0 : i32
    %c0_i32_0 = arith.constant 0 : i32
    %c0_i32_1 = arith.constant 0 : i32
    return %c0_i32, %c0_i32_0 : i32, i32
  }
  func.func @transform_4(%arg0: i32, %arg1: i32) -> (i32, i32) {
    %c0_i32 = arith.constant 0 : i32
    %c0_i32_0 = arith.constant 0 : i32
    %c0_i32_1 = arith.constant 0 : i32
    return %c0_i32, %c0_i32_0 : i32, i32
  }
  func.func @transform_5(%arg0: i32, %arg1: i32) -> (i32, i32) {
    %c0_i32 = arith.constant 0 : i32
    %c0_i32_0 = arith.constant 0 : i32
    return %c0_i32, %arg1 : i32, i32
  }
  func.func @transform_6(%arg0: i32, %arg1: i32) -> (i32, i32) {
    %c0_i32 = arith.constant 0 : i32
    %c0_i32_0 = arith.constant 0 : i32
    return %c0_i32, %arg1 : i32, i32
  }
  func.func @transform_7(%arg0: i32, %arg1: i32) -> (i32, i32) {
    %c0_i32 = arith.constant 0 : i32
    return %arg0, %arg1 : i32, i32
  }
}

</mosaic_0001>

<bundles_post_ra>
// kernel: tpu_custom_call.1
= control target key start
LH: loop header
LB: loop body
LE: loop exit
PB: predicated region body
PF: predicated region fallthrough
CT: control target
= control target key end

     0   :  { %12 = vsyncpa [#allocation4], 0  ;;  %s2042_s0 = inlined_call_operand.hbm [shape: f32[64,128], index: 0, kind: input, shape index: {}]   ;;  %s2043_s1 = inlined_call_operand.hbm [shape: bf16[128,256], index: 1, kind: input, shape index: {}]   ;;  %s2044_s2 = inlined_call_operand.vmem [shape: f32[1,256], index: 2, kind: input, shape index: {}]   ;;  %s2045_s3 = inlined_call_operand.hbm [shape: bf16[256,256], index: 3, kind: input, shape index: {}]   ;;  %s2046_s4 = inlined_call_operand.hbm [shape: f32[1,256], index: 4, kind: input, shape index: {}]   ;;  %s2047_s5 = inlined_call_operand.hbm [shape: bf16[256,512], index: 5, kind: input, shape index: {}]   ;;  %s2048_s6 = inlined_call_operand.vmem [shape: f32[1,512], index: 6, kind: input, shape index: {}]   ;;  %s2049_s7 = inlined_call_operand.hbm [shape: f32[64,512], index: 7, kind: output, shape index: {}]  }
   0x1   :  { %13 = vsyncpa [#allocation7], 0 }
   0x2   :  { %14 = vsyncpa [#allocation10], 0 }
   0x3   :  { %15 = vsyncpa [#allocation5], 0  ;;  %s1856_s24 = smov [#allocation6]   ;;  %s1857_s26 = smov [#allocation9]  }
   0x4   :  { %s33_s25 = sshll.u32 %s1856_s24, 4  ;;  %s60_s27 = sshll.u32 %s1857_s26, 4  ;;  %s34_s25 = int_to_ptr.vmem [resolvable:$true] %s33_s25  ;;  %s61_s27 = int_to_ptr.vmem [resolvable:$true] %s60_s27 }
   0x5   :  { %s1736_s28 = scalar_lea.vmem %s34_s25, 2048  ;;  %p1741_p1 = scmp.lt.s32.totalorder %s34_s25, %s34_s25 }
   0x6   :  { %p1737_p0 = scmp.ne.s32.totalorder %s34_s25, %s1736_s28  ;;  %p1742_p2 = scmp.lt.s32.totalorder %s1736_s28, %s1736_s28 }
   0x8   :  { %p1743_p3 = por %p1742_p2, %p1741_p1 }
   0xa   :  { %p1744_p4 = pnand %p1743_p3, %p1737_p0 }
   0xc   :  { %1747 = shalt.err (!%p1744_p4)
}
   0xd   :  { %s1858_s29 = smov 128   ;;  %s1859_s30 = smov 8  }
   0xe   :  { %39 = dma.hbm_to_vmem [thread:$0]  %s2043_s1, 2048, %s34_s25, [#allocation7], %s1858_s29, %s1858_s29, %s1859_s30  }
   0xf   :  { %s1756_s10 = scalar_lea.vmem %s61_s27, 32  ;;  %p1761_p6 = scmp.lt.s32.totalorder %s61_s27, %s61_s27 }
  0x10   :  { %p1757_p5 = scmp.ne.s32.totalorder %s61_s27, %s1756_s10  ;;  %p1762_p7 = scmp.lt.s32.totalorder %s1756_s10, %s1756_s10 }
  0x12   :  { %p1763_p8 = por %p1762_p7, %p1761_p6 }
  0x14   :  { %p1764_p9 = pnand %p1763_p8, %p1757_p5 }
  0x16   :  { %1767 = shalt.err (!%p1764_p9)
}
  0x17   :  { %63 = dma.hbm_to_vmem [thread:$0]  %s2046_s4, 32, %s61_s27, [#allocation10]  }
  0x18   :  { %s1860_s13 = smov [#allocation3]   ;;  %s1861_s15 = smov [#allocation8]  }
  0x19   :  { %s21_s14 = sshll.u32 %s1860_s13, 4  ;;  %s47_s16 = sshll.u32 %s1861_s15, 4  ;;  %s22_s14 = int_to_ptr.vmem [resolvable:$true] %s21_s14  ;;  %s48_s16 = int_to_ptr.vmem [resolvable:$true] %s47_s16 }
  0x1a   :  { %s1776_s17 = scalar_lea.vmem %s22_s14, 1024  ;;  %p1781_p11 = scmp.lt.s32.totalorder %s22_s14, %s22_s14 }
  0x1b   :  { %p1777_p10 = scmp.ne.s32.totalorder %s22_s14, %s1776_s17  ;;  %p1782_p12 = scmp.lt.s32.totalorder %s1776_s17, %s1776_s17 }
  0x1d   :  { %p1783_p13 = por %p1782_p12, %p1781_p11 }
  0x1f   :  { %p1784_p0 = pnand %p1783_p13, %p1777_p10 }
  0x21   :  { %1787 = shalt.err (!%p1784_p0)
}
  0x22   :  { %27 = dma.hbm_to_vmem [thread:$0]  %s2042_s0, 1024, %s22_s14, [#allocation4], %s1858_s29, %s1858_s29, %s1859_s30  }
  0x23   :  { %s1796_s4 = scalar_lea.vmem %s48_s16, 4096  ;;  %p1801_p2 = scmp.lt.s32.totalorder %s48_s16, %s48_s16 }
  0x24   :  { %p1797_p1 = scmp.ne.s32.totalorder %s48_s16, %s1796_s4  ;;  %p1802_p3 = scmp.lt.s32.totalorder %s1796_s4, %s1796_s4 }
  0x26   :  { %p1803_p4 = por %p1802_p3, %p1801_p2 }
  0x28   :  { %p1804_p5 = pnand %p1803_p4, %p1797_p1 }
  0x2a   :  { %1807 = shalt.err (!%p1804_p5)
}
  0x2b   :  { %53 = dma.hbm_to_vmem [thread:$0]  %s2045_s3, 4096, %s48_s16, [#allocation7], %s1858_s29, %s1858_s29, %s1859_s30  }
  0x2c   :  { %s1862_s21 = smov [#allocation11]  }
  0x2d   :  { %s69_s22 = sshll.u32 %s1862_s21, 4  ;;  %s70_s22 = int_to_ptr.vmem [resolvable:$true] %s69_s22 }
  0x2e   :  { %s1816_s23 = scalar_lea.vmem %s70_s22, 8192  ;;  %p1821_p7 = scmp.lt.s32.totalorder %s70_s22, %s70_s22 }
  0x2f   :  { %p1817_p6 = scmp.ne.s32.totalorder %s70_s22, %s1816_s23  ;;  %p1822_p8 = scmp.lt.s32.totalorder %s1816_s23, %s1816_s23 }
  0x31   :  { %p1823_p9 = por %p1822_p8, %p1821_p7 }
  0x33   :  { %p1824_p10 = pnand %p1823_p9, %p1817_p6 }
  0x35   :  { %1827 = shalt.err (!%p1824_p10)
}
  0x36   :  { %s1863_s0 = smov 256   ;;  %s1864_s24 = smov 16  }
  0x37   :  { %75 = dma.hbm_to_vmem [thread:$0]  %s2047_s5, 8192, %s70_s22, [#allocation10], %s1863_s0, %s1863_s0, %s1864_s24  }
  0x38   :  { %1848 = dma.done.wait [#allocation4], 1024  }
  0x39   :  { %1849 = vsyncadd [#allocation4], 4294966272 }
  0x3a   :  { %1850 = dma.done.wait [#allocation7], 6144  }
  0x3b   :  { %1851 = vsyncadd [#allocation7], 4294961152 }
  0x3c   :  { %1852 = dma.done.wait [#allocation10], 8224  }
  0x3d   :  { %1853 = vsyncadd [#allocation10], 4294959072  ;;  %v1865_v0 = vmov 0   ;;  %v1560_v1 = vld [vmem:[#allocation6 + $0x74] ss:$8 sps:$4 sm:$0xff]   ;;  %v98_v17 = vld [vmem:[#allocation3] sm:$0xff] }
  0x3e   :  { %274 = vmatprep.mubr.bf16.mxu0 %v1865_v0  ;;  %v1562_v2 = vld [vmem:[#allocation6 + $0x70] ss:$8 sps:$4 sm:$0xff]   ;;  %242 = vmatprep.subr.bf16.mxu0 %v1560_v1  ;;  %v1563_v3 = vld [vmem:[#allocation6 + $0x64] ss:$8 sps:$4 sm:$0xff]   ;;  %v1565_v4 = vld [vmem:[#allocation6 + $0x60] ss:$8 sps:$4 sm:$0xff]  }
  0x3f   :  { %243 = vmatpush1.bf16.msra.mxu0 %v1562_v2  ;;  %v1566_v5 = vld [vmem:[#allocation6 + $0x54] ss:$8 sps:$4 sm:$0xff]   ;;  %v1568_v6 = vld [vmem:[#allocation6 + $0x50] ss:$8 sps:$4 sm:$0xff]   ;;  %v1569_v7 = vld [vmem:[#allocation6 + $0x44] ss:$8 sps:$4 sm:$0xff]  }
  0x40   :  { %244 = vmatprep.subr.bf16.mxu0 %v1563_v3  ;;  %v1571_v8 = vld [vmem:[#allocation6 + $0x40] ss:$8 sps:$4 sm:$0xff]   ;;  %v1572_v9 = vld [vmem:[#allocation6 + $0x34] ss:$8 sps:$4 sm:$0xff]   ;;  %v1574_v10 = vld [vmem:[#allocation6 + $0x30] ss:$8 sps:$4 sm:$0xff]  }
  0x41   :  { %v1575_v11 = vld [vmem:[#allocation6 + $0x24] ss:$8 sps:$4 sm:$0xff]   ;;  %v1584_v12 = vld [vmem:[#allocation8 + $0x74] ss:$8 sps:$4 sm:$0xff]   ;;  %v1586_v13 = vld [vmem:[#allocation8 + $0x70] ss:$8 sps:$4 sm:$0xff]  }
  0x42   :  { %v1577_v14 = vld [vmem:[#allocation6 + $0x20] ss:$8 sps:$4 sm:$0xff]   ;;  %v1578_v15 = vld [vmem:[#allocation6 + $0x14] ss:$8 sps:$4 sm:$0xff]   ;;  %575 = vmatprep.subr.bf16.mxu1 %v1584_v12  ;;  %v1587_v16 = vld [vmem:[#allocation8 + $0x64] ss:$8 sps:$4 sm:$0xff]  }
  0x43   :  { %245 = vmatpush1.bf16.msra.mxu0 %v1565_v4  ;;  %576 = vmatpush1.bf16.msra.mxu1 %v1586_v13  ;;  %v1589_v18 = vld [vmem:[#allocation8 + $0x60] ss:$8 sps:$4 sm:$0xff]   ;;  %v1590_v20 = vld [vmem:[#allocation8 + $0x54] ss:$8 sps:$4 sm:$0xff]   ;;  %v1580_v21 = vld [vmem:[#allocation6 + $0x10] ss:$8 sps:$4 sm:$0xff]  }
  0x44   :  { %246 = vmatprep.subr.bf16.mxu0 %v1566_v5  ;;  %v99_v19 = vld [vmem:[#allocation3 + $0x8] sm:$0xff]  ;;  %577 = vmatprep.subr.bf16.mxu1 %v1587_v16  ;;  %v114_v23 = vmul.f32 0.15, %v98_v17  ;;  %v1592_v25 = vld [vmem:[#allocation8 + $0x50] ss:$8 sps:$4 sm:$0xff]   ;;  %vm106_vm0 = vcmp.gt.f32.partialorder %v98_v17, 0.0 }
  0x45   :  { %v1581_v22 = vld [vmem:[#allocation6 + $0x4] ss:$8 sps:$4 sm:$0xff]   ;;  %v115_v24 = vmul.f32 0.15, %v99_v19  ;;  %vm107_vm1 = vcmp.gt.f32.partialorder %v99_v19, 0.0  ;;  %v100_v30 = vld [vmem:[#allocation3 + $0x10] sm:$0xff] }
  0x46   :  { %v1593_v26 = vld [vmem:[#allocation8 + $0x44] ss:$8 sps:$4 sm:$0xff]   ;;  %v1583_v27 = vld [vmem:[#allocation6] ss:$8 sps:$4 sm:$0xff]   ;;  %v122_v28 = vsel %vm106_vm0, %v98_v17, %v114_v23  ;;  %v101_v32 = vld [vmem:[#allocation3 + $0x18] sm:$0xff]  ;;  %vm108_vm2 = vcmp.gt.f32.partialorder %v100_v30, 0.0 }
  0x47   :  { %247 = vmatpush1.bf16.msra.mxu0 %v1568_v6  ;;  %578 = vmatpush1.bf16.msra.mxu1 %v1589_v18  ;;  %v123_v29 = vsel %vm107_vm1, %v99_v19, %v115_v24  ;;  %v1595_v31 = vld [vmem:[#allocation8 + $0x40] ss:$8 sps:$4 sm:$0xff]   ;;  %v1596_v33 = vld [vmem:[#allocation8 + $0x34] ss:$8 sps:$4 sm:$0xff]   ;;  %v116_v35 = vmul.f32 0.15, %v100_v30 }
  0x48   :  { %248 = vmatprep.subr.bf16.mxu0 %v1569_v7  ;;  %579 = vmatprep.subr.bf16.mxu1 %v1590_v20  ;;  %v130_v34 = vpack.c.bf16 %v123_v29, %v122_v28  ;;  %v117_v36 = vmul.f32 0.15, %v101_v32  ;;  %v1598_v37 = vld [vmem:[#allocation8 + $0x30] ss:$8 sps:$4 sm:$0xff]   ;;  %vm109_vm3 = vcmp.gt.f32.partialorder %v101_v32, 0.0  ;;  %v102_v39 = vld [vmem:[#allocation3 + $0x20] sm:$0xff] }
  0x49   :  { %v1599_v38 = vld [vmem:[#allocation8 + $0x24] ss:$8 sps:$4 sm:$0xff]   ;;  %v1601_v40 = vld [vmem:[#allocation8 + $0x20] ss:$8 sps:$4 sm:$0xff]   ;;  %v1602_v42 = vld [vmem:[#allocation8 + $0x14] ss:$8 sps:$4 sm:$0xff]   ;;  %v124_v43 = vsel %vm108_vm2, %v100_v30, %v116_v35 }
  0x4a   :  { %v103_v41 = vld [vmem:[#allocation3 + $0x28] sm:$0xff]  ;;  %v125_v44 = vsel %vm109_vm3, %v101_v32, %v117_v36  ;;  %v1604_v45 = vld [vmem:[#allocation8 + $0x10] ss:$8 sps:$4 sm:$0xff]   ;;  %v118_v47 = vmul.f32 0.15, %v102_v39  ;;  %vm110_vm4 = vcmp.gt.f32.partialorder %v102_v39, 0.0 }
  0x4b   :  { %249 = vmatpush1.bf16.msra.mxu0 %v1571_v8  ;;  %580 = vmatpush1.bf16.msra.mxu1 %v1592_v25  ;;  %v131_v46 = vpack.c.bf16 %v125_v44, %v124_v43  ;;  %v1605_v48 = vld [vmem:[#allocation8 + $0x4] ss:$8 sps:$4 sm:$0xff]   ;;  %v119_v49 = vmul.f32 0.15, %v103_v41  ;;  %vm111_vm5 = vcmp.gt.f32.partialorder %v103_v41, 0.0  ;;  %v104_v50 = vld [vmem:[#allocation3 + $0x30] sm:$0xff] }
  0x4c   :  { %250 = vmatprep.subr.bf16.mxu0 %v1572_v9  ;;  %581 = vmatprep.subr.bf16.mxu1 %v1593_v26  ;;  %v1607_v51 = vld [vmem:[#allocation8] ss:$8 sps:$4 sm:$0xff]   ;;  %v105_v52 = vld [vmem:[#allocation3 + $0x38] sm:$0xff]  ;;  %v126_v54 = vsel %vm110_vm4, %v102_v39, %v118_v47  ;;  %v120_v58 = vmul.f32 0.15, %v104_v50  ;;  %vm112_vm6 = vcmp.gt.f32.partialorder %v104_v50, 0.0 }
  0x4d   :  { %v1608_v53 = vld [vmem:[#allocation8 + $0xf4] ss:$8 sps:$4 sm:$0xff]   ;;  %v127_v55 = vsel %vm111_vm5, %v103_v41, %v119_v49  ;;  %v1610_v56 = vld [vmem:[#allocation8 + $0xf0] ss:$8 sps:$4 sm:$0xff]   ;;  %v1611_v59 = vld [vmem:[#allocation8 + $0xe4] ss:$8 sps:$4 sm:$0xff]  }
  0x4e   :  { %v132_v57 = vpack.c.bf16 %v127_v55, %v126_v54  ;;  %v121_v60 = vmul.f32 0.15, %v105_v52  ;;  %vm113_vm7 = vcmp.gt.f32.partialorder %v105_v52, 0.0  ;;  %v1613_v61 = vld [vmem:[#allocation8 + $0xe0] ss:$8 sps:$4 sm:$0xff]   ;;  %v128_v63 = vsel %vm112_vm6, %v104_v50, %v120_v58 }
  0x4f   :  { %251 = vmatpush1.bf16.msra.mxu0 %v1574_v10  ;;  %582 = vmatpush1.bf16.msra.mxu1 %v1595_v31  ;;  %v1614_v62 = vld [vmem:[#allocation8 + $0xd4] ss:$8 sps:$4 sm:$0xff]   ;;  %v1616_v2 = vld [vmem:[#allocation8 + $0xd0] ss:$8 sps:$4 sm:$0xff]   ;;  %v1617_v4 = vld [vmem:[#allocation8 + $0xc4] ss:$8 sps:$4 sm:$0xff]  }
  0x50   :  { %252 = vmatprep.subr.bf16.mxu0 %v1575_v11  ;;  %583 = vmatprep.subr.bf16.mxu1 %v1596_v33  ;;  %v129_v1 = vsel %vm113_vm7, %v105_v52, %v121_v60  ;;  %v1619_v5 = vld [vmem:[#allocation8 + $0xc0] ss:$8 sps:$4 sm:$0xff]   ;;  %v1620_v6 = vld [vmem:[#allocation8 + $0xb4] ss:$8 sps:$4 sm:$0xff]   ;;  %v1622_v7 = vld [vmem:[#allocation8 + $0xb0] ss:$8 sps:$4 sm:$0xff]  }
  0x51   :  { %v133_v3 = vpack.c.bf16 %v129_v1, %v128_v63  ;;  %v1623_v8 = vld [vmem:[#allocation8 + $0xa4] ss:$8 sps:$4 sm:$0xff]   ;;  %v1626_v9 = vld [vmem:[#allocation8 + $0x94] ss:$8 sps:$4 sm:$0xff]   ;;  %v1628_v10 = vld [vmem:[#allocation8 + $0x90] ss:$8 sps:$4 sm:$0xff]  }
  0x52   :  { %v1629_v11 = vld [vmem:[#allocation8 + $0x84] ss:$8 sps:$4 sm:$0xff]   ;;  %v1631_v12 = vld [vmem:[#allocation8 + $0x80] ss:$8 sps:$4 sm:$0xff]  }
  0x53   :  { %253 = vmatpush1.bf16.msra.mxu0 %v1577_v14  ;;  %584 = vmatpush1.bf16.msra.mxu1 %v1598_v37  ;;  %v1632_v13 = vld [vmem:[#allocation11 + $0xe0] ss:$16 sps:$4 sm:$0xff]   ;;  %v1634_v14 = vld [vmem:[#allocation11 + $0xe4] ss:$16 sps:$4 sm:$0xff]   ;;  %v150_v44 = vld [vmem:[%s2044_s2] sm:$0x3] }
  0x54   :  { %254 = vmatprep.subr.bf16.mxu0 %v1578_v15  ;;  %585 = vmatprep.subr.bf16.mxu1 %v1599_v38  ;;  %v1637_v15 = vld [vmem:[#allocation11 + $0xec] ss:$16 sps:$4 sm:$0xff]   ;;  %v1640_v16 = vld [vmem:[#allocation11 + $0xc4] ss:$16 sps:$4 sm:$0xff]   ;;  %v1638_v17 = vld [vmem:[#allocation11 + $0xc0] ss:$16 sps:$4 sm:$0xff]  }
  0x55   :  { %v1646_v18 = vld [vmem:[#allocation11 + $0xa4] ss:$16 sps:$4 sm:$0xff]   ;;  %v1644_v19 = vld [vmem:[#allocation11 + $0xa0] ss:$16 sps:$4 sm:$0xff]  }
  0x56   :  { %v1652_v20 = vld [vmem:[#allocation11 + $0x84] ss:$16 sps:$4 sm:$0xff]   ;;  %v1656_v23 = vld [vmem:[#allocation11 + $0x60] ss:$16 sps:$4 sm:$0xff]  }
  0x57   :  { %255 = vmatpush1.bf16.msra.mxu0 %v1580_v21  ;;  %586 = vmatpush1.bf16.msra.mxu1 %v1601_v40  ;;  %v1650_v21 = vld [vmem:[#allocation11 + $0x80] ss:$16 sps:$4 sm:$0xff]   ;;  %v1664_v24 = vld [vmem:[#allocation11 + $0x44] ss:$16 sps:$4 sm:$0xff]   ;;  %v152_v40 = vlaneseq }
  0x58   :  { %256 = vmatprep.subr.bf16.mxu0 %v1581_v22  ;;  %587 = vmatprep.subr.bf16.mxu1 %v1602_v42  ;;  %v1658_v22 = vld [vmem:[#allocation11 + $0x64] ss:$16 sps:$4 sm:$0xff]   ;;  %v1662_v25 = vld [vmem:[#allocation11 + $0x40] ss:$16 sps:$4 sm:$0xff]  }
  0x59   :  { %v1670_v26 = vld [vmem:[#allocation11 + $0x24] ss:$16 sps:$4 sm:$0xff]   ;;  %v1674_v29 = vld [vmem:[#allocation11] ss:$16 sps:$4 sm:$0xff]   ;;  %v1937_v41 = vshrl.u32 %v152_v40, 7 }
  0x5a   :  { %v1676_v28 = vld [vmem:[#allocation11 + $0x4] ss:$16 sps:$4 sm:$0xff]   ;;  %v1680_v31 = vld [vmem:[#allocation11 + $0x1e0] ss:$16 sps:$4 sm:$0xff]  }
  0x5b   :  { %257 = vmatpush1.bf16.msra.mxu0 %v1583_v27  ;;  %588 = vmatpush1.bf16.msra.mxu1 %v1604_v45  ;;  %v1668_v27 = vld [vmem:[#allocation11 + $0x20] ss:$16 sps:$4 sm:$0xff]   ;;  %v1682_v30 = vld [vmem:[#allocation11 + $0x1e4] ss:$16 sps:$4 sm:$0xff]   ;;  %v1940_v42 = vsub.s32 1, %v1937_v41  ;;  %v1943_v43 = vsub.s32 0, %v1937_v41 }
  0x5c   :  { %589 = vmatprep.subr.bf16.mxu1 %v1605_v48  ;;  %1206 = vmatprep.subr.bf16.mxu0 %v1634_v14  ;;  %v1688_v32 = vld [vmem:[#allocation11 + $0x1c4] ss:$16 sps:$4 sm:$0xff]   ;;  %v1686_v33 = vld [vmem:[#allocation11 + $0x1c0] ss:$16 sps:$4 sm:$0xff]  }
  0x5d   :  { %v1692_v35 = vld [vmem:[#allocation11 + $0x1a0] ss:$16 sps:$4 sm:$0xff]   ;;  %v1700_v36 = vld [vmem:[#allocation11 + $0x184] ss:$16 sps:$4 sm:$0xff]   ;;  %v1949_v45 = vrot.slane %v150_v44, %v1940_v42 }
  0x5e   :  { %275 = vmatmul.mubr.bf16.vlgmr.msra.gmra.mxu0 %v130_v34  ;;  %v1694_v34 = vld [vmem:[#allocation11 + $0x1a4] ss:$16 sps:$4 sm:$0xff]   ;;  %v1698_v37 = vld [vmem:[#allocation11 + $0x180] ss:$16 sps:$4 sm:$0xff]  }
  0x5f   :  { %284 = vmatprep.mubr.bf16.mxu0 %v1865_v0  ;;  %590 = vmatpush1.bf16.msra.mxu1 %v1607_v51  ;;  %v1706_v38 = vld [vmem:[#allocation11 + $0x164] ss:$16 sps:$4 sm:$0xff]   ;;  %v1704_v39 = vld [vmem:[#allocation11 + $0x160] ss:$16 sps:$4 sm:$0xff]  }
  0x60   :  { %591 = vmatprep.subr.bf16.mxu1 %v1608_v53  ;;  %1207 = vmatpush1.bf16.msra.mxu0 %v1632_v13 }
  0x61   :  { %1208 = vmatprep.subr.bf16.mxu0 %v1640_v16 }
  0x63   :  { %592 = vmatpush2.bf16.msra.mxu1 %v1610_v56 }
  0x64   :  { %593 = vmatprep.subr.bf16.mxu1 %v1611_v59  ;;  %1209 = vmatpush1.bf16.msra.mxu0 %v1638_v17  ;;  %v1649_v17 = vld [vmem:[#allocation11 + $0xac] ss:$16 sps:$4 sm:$0xff]  }
  0x65   :  { %1210 = vmatprep.subr.bf16.mxu0 %v1646_v18 }
  0x66   :  { %285 = vmatmul.mubr.bf16.gmra.mxu0 %v131_v46  ;;  %v1952_v46 = vrot.slane %v150_v44, %v1943_v43 }
  0x67   :  { %294 = vmatprep.mubr.bf16.mxu0 %v1865_v0  ;;  %594 = vmatpush2.bf16.msra.mxu1 %v1613_v61 }
  0x68   :  { %595 = vmatprep.subr.bf16.mxu1 %v1614_v62  ;;  %1211 = vmatpush1.bf16.msra.mxu0 %v1644_v19 }
  0x69   :  { %1212 = vmatprep.subr.bf16.mxu0 %v1652_v20 }
  0x6b   :  { %596 = vmatpush2.bf16.msra.mxu1 %v1616_v2 }
  0x6c   :  { %597 = vmatprep.subr.bf16.mxu1 %v1617_v4  ;;  %1213 = vmatpush1.bf16.msra.mxu0 %v1650_v21 }
  0x6d   :  { %1214 = vmatprep.subr.bf16.mxu0 %v1658_v22 }
  0x6e   :  { %295 = vmatmul.mubr.bf16.gmra.mxu0 %v132_v57 }
  0x6f   :  { %304 = vmatprep.mubr.bf16.mxu0 %v1865_v0  ;;  %598 = vmatpush2.bf16.msra.mxu1 %v1619_v5  ;;  %v1625_v0 = vld [vmem:[#allocation8 + $0xa0] ss:$8 sps:$4 sm:$0xff]  }
  0x70   :  { %599 = vmatprep.subr.bf16.mxu1 %v1620_v6  ;;  %1215 = vmatpush1.bf16.msra.mxu0 %v1656_v23  ;;  %v1635_v6 = vld [vmem:[#allocation11 + $0xe8] ss:$16 sps:$4 sm:$0xff]  }
  0x71   :  { %1216 = vmatprep.subr.bf16.mxu0 %v1664_v24 }
  0x73   :  { %600 = vmatpush2.bf16.msra.mxu1 %v1622_v7 }
  0x74   :  { %601 = vmatprep.subr.bf16.mxu1 %v1623_v8  ;;  %1217 = vmatpush1.bf16.msra.mxu0 %v1662_v25 }
  0x75   :  { %1218 = vmatprep.subr.bf16.mxu0 %v1670_v26 }
  0x76   :  { %305 = vmatmul.mubr.bf16.gmra.mxu0 %v133_v3 }
  0x77   :  { %602 = vmatpush2.bf16.msra.mxu1 %v1625_v0  ;;  %v1643_v0 = vld [vmem:[#allocation11 + $0xcc] ss:$16 sps:$4 sm:$0xff]  }
  0x78   :  { %603 = vmatprep.subr.bf16.mxu1 %v1626_v9  ;;  %1219 = vmatpush1.bf16.msra.mxu0 %v1668_v27  ;;  %v1647_v27 = vld [vmem:[#allocation11 + $0xa8] ss:$16 sps:$4 sm:$0xff]  }
  0x79   :  { %1220 = vmatprep.subr.bf16.mxu0 %v1676_v28 }
  0x7b   :  { %604 = vmatpush2.bf16.msra.mxu1 %v1628_v10 }
  0x7c   :  { %605 = vmatprep.subr.bf16.mxu1 %v1629_v11  ;;  %1221 = vmatpush1.bf16.msra.mxu0 %v1674_v29 }
  0x7d   :  { %1222 = vmatprep.subr.bf16.mxu0 %v1682_v30  ;;  %v1655_v30 = vld [vmem:[#allocation11 + $0x8c] ss:$16 sps:$4 sm:$0xff]  }
  0x7f   :  { %606 = vmatpush2.bf16.msra.mxu1 %v1631_v12 }
  0x80   :  { %1279 = vmatprep.subr.bf16.mxu1 %v1637_v15  ;;  %1223 = vmatpush2.bf16.msra.mxu0 %v1680_v31  ;;  %v1641_v15 = vld [vmem:[#allocation11 + $0xc8] ss:$16 sps:$4 sm:$0xff]  }
  0x81   :  { %1224 = vmatprep.subr.bf16.mxu0 %v1688_v32 }
  0x84   :  { %1225 = vmatpush2.bf16.msra.mxu0 %v1686_v33 }
  0x85   :  { %1226 = vmatprep.subr.bf16.mxu0 %v1694_v34 }
  0x88   :  { %1227 = vmatpush2.bf16.msra.mxu0 %v1692_v35 }
  0x89   :  { %1228 = vmatprep.subr.bf16.mxu0 %v1700_v36 }
  0x8c   :  { %1229 = vmatpush2.bf16.msra.mxu0 %v1698_v37  ;;  %v1653_v37 = vld [vmem:[#allocation11 + $0x88] ss:$16 sps:$4 sm:$0xff]  }
  0x8d   :  { %1230 = vmatprep.subr.bf16.mxu0 %v1706_v38 }
  0x90   :  { %1231 = vmatpush2.bf16.msra.mxu0 %v1704_v39  ;;  %v1661_v39 = vld [vmem:[#allocation11 + $0x6c] ss:$16 sps:$4 sm:$0xff]  }
 0x11e   :  { %v276_v47 = vpop.f32.mrf.mxu0 }
 0x11f   :  { %v277_v50 = vadd.f32 %v276_v47, %v1952_v46 }
 0x120   :  { %v278_v48 = vpop.f32.mrf.mxu0 }
 0x121   :  { %v279_v49 = vadd.f32 %v278_v48, %v1949_v45  ;;  %v331_v57 = vmul.f32 0.15, %v277_v50  ;;  %vm315_vm10 = vcmp.gt.f32.partialorder %v277_v50, 0.0 }
 0x122   :  { %v280_v51 = vpop.f32.mrf.mxu0 }
 0x123   :  { %v281_v52 = vadd.f32 %v280_v51, %v1952_v46  ;;  %v332_v54 = vmul.f32 0.15, %v279_v49  ;;  %vm316_vm9 = vcmp.gt.f32.partialorder %v279_v49, 0.0  ;;  %v347_v5 = vsel %vm315_vm10, %v277_v50, %v331_v57  ;;  %v1667_v57 = vld [vmem:[#allocation11 + $0x4c] ss:$16 sps:$4 sm:$0xff]  }
 0x124   :  { %v282_v53 = vpop.f32.mrf.mxu0 }
 0x125   :  { %vm317_vm8 = vcmp.gt.f32.partialorder %v281_v52, 0.0  ;;  %v333_v55 = vmul.f32 0.15, %v281_v52  ;;  %v283_v56 = vadd.f32 %v282_v53, %v1949_v45  ;;  %v348_v63 = vsel %vm316_vm9, %v279_v49, %v332_v54  ;;  %v1659_v54 = vld [vmem:[#allocation11 + $0x68] ss:$16 sps:$4 sm:$0xff]  }
 0x126   :  { %v286_v58 = vpop.f32.mrf.mxu0 }
 0x127   :  { %v334_v59 = vmul.f32 0.15, %v283_v56  ;;  %vm318_vm11 = vcmp.gt.f32.partialorder %v283_v56, 0.0  ;;  %v349_v61 = vsel %vm317_vm8, %v281_v52, %v333_v55  ;;  %v287_v2 = vadd.f32 %v286_v58, %v1952_v46 }
 0x128   :  { %v288_v60 = vpop.f32.mrf.mxu0  ;;  %v363_v8 = vpack.c.bf16 %v349_v61, %v347_v5 }
 0x129   :  { %v289_v62 = vadd.f32 %v288_v60, %v1949_v45  ;;  %v350_v1 = vsel %vm318_vm11, %v283_v56, %v334_v59  ;;  %v335_v13 = vmul.f32 0.15, %v287_v2  ;;  %vm319_vm14 = vcmp.gt.f32.partialorder %v287_v2, 0.0 }
 0x12a   :  { %v290_v3 = vpop.f32.mrf.mxu0  ;;  %v364_v4 = vpack.c.bf16 %v350_v1, %v348_v63  ;;  %v1665_v63 = vld [vmem:[#allocation11 + $0x48] ss:$16 sps:$4 sm:$0xff]  }
 0x12b   :  { %v291_v7 = vadd.f32 %v290_v3, %v1952_v46  ;;  %v336_v10 = vmul.f32 0.15, %v289_v62  ;;  %vm320_vm13 = vcmp.gt.f32.partialorder %v289_v62, 0.0  ;;  %v351_v26 = vsel %vm319_vm14, %v287_v2, %v335_v13  ;;  %v1697_v13 = vld [vmem:[#allocation11 + $0x1ac] ss:$16 sps:$4 sm:$0xff]  }
 0x12c   :  { %v292_v9 = vpop.f32.mrf.mxu0  ;;  %607 = vmatprep.mubr.bf16.mxu1 %v364_v4 }
 0x12d   :  { %vm321_vm12 = vcmp.gt.f32.partialorder %v291_v7, 0.0  ;;  %v337_v11 = vmul.f32 0.15, %v291_v7  ;;  %v293_v12 = vadd.f32 %v292_v9, %v1949_v45  ;;  %608 = vmatmul.mubr.bf16.vlgmr.msra.gmra.mxu1 %v363_v8  ;;  %v352_v21 = vsel %vm320_vm13, %v289_v62, %v336_v10  ;;  %v1685_v9 = vld [vmem:[#allocation11 + $0x1ec] ss:$16 sps:$4 sm:$0xff]  }
 0x12e   :  { %v296_v14 = vpop.f32.mrf.mxu0  ;;  %1280 = vmatpush1.bf16.msra.mxu1 %v1635_v6  ;;  %v1683_v10 = vld [vmem:[#allocation11 + $0x1e8] ss:$16 sps:$4 sm:$0xff]  }
 0x12f   :  { %vm322_vm15 = vcmp.gt.f32.partialorder %v293_v12, 0.0  ;;  %v338_v16 = vmul.f32 0.15, %v293_v12  ;;  %1281 = vmatprep.subr.bf16.mxu1 %v1643_v0  ;;  %v353_v19 = vsel %vm321_vm12, %v291_v7, %v337_v11  ;;  %v297_v23 = vadd.f32 %v296_v14, %v1952_v46  ;;  %v1671_v7 = vld [vmem:[#allocation11 + $0x28] ss:$16 sps:$4 sm:$0xff]  }
 0x130   :  { %v298_v18 = vpop.f32.mrf.mxu0  ;;  %v365_v29 = vpack.c.bf16 %v353_v19, %v351_v26  ;;  %v1677_v0 = vld [vmem:[#allocation11 + $0x8] ss:$16 sps:$4 sm:$0xff]   ;;  %v1691_v11 = vld [vmem:[#allocation11 + $0x1cc] ss:$16 sps:$4 sm:$0xff]   ;;  %v1712_v19 = vld [vmem:[#allocation11 + $0x144] ss:$16 sps:$4 sm:$0xff]  }
 0x131   :  { %v299_v20 = vadd.f32 %v298_v18, %v1949_v45  ;;  %v354_v22 = vsel %vm322_vm15, %v293_v12, %v338_v16  ;;  %v339_v35 = vmul.f32 0.15, %v297_v23  ;;  %vm323_vm2 = vcmp.gt.f32.partialorder %v297_v23, 0.0  ;;  %v1689_v12 = vld [vmem:[#allocation11 + $0x1c8] ss:$16 sps:$4 sm:$0xff]   ;;  %1232 = vmatprep.subr.bf16.mxu0 %v1712_v19 }
 0x132   :  { %v300_v24 = vpop.f32.mrf.mxu0  ;;  %v366_v25 = vpack.c.bf16 %v354_v22, %v352_v21  ;;  %1282 = vmatpush1.bf16.msra.mxu1 %v1641_v15  ;;  %v1695_v14 = vld [vmem:[#allocation11 + $0x1a8] ss:$16 sps:$4 sm:$0xff]   ;;  %v1703_v15 = vld [vmem:[#allocation11 + $0x18c] ss:$16 sps:$4 sm:$0xff]   ;;  %v1710_v21 = vld [vmem:[#allocation11 + $0x140] ss:$16 sps:$4 sm:$0xff]  }
 0x133   :  { %v301_v28 = vadd.f32 %v300_v24, %v1952_v46  ;;  %1283 = vmatprep.subr.bf16.mxu1 %v1649_v17  ;;  %v340_v32 = vmul.f32 0.15, %v299_v20  ;;  %vm324_vm1 = vcmp.gt.f32.partialorder %v299_v20, 0.0  ;;  %v355_v53 = vsel %vm323_vm2, %v297_v23, %v339_v35  ;;  %v1701_v16 = vld [vmem:[#allocation11 + $0x188] ss:$16 sps:$4 sm:$0xff]   ;;  %1233 = vmatpush2.bf16.msra.mxu0 %v1710_v21 }
 0x134   :  { %v302_v31 = vpop.f32.mrf.mxu0  ;;  %617 = vmatprep.mubr.bf16.mxu1 %v366_v25  ;;  %v1709_v17 = vld [vmem:[#allocation11 + $0x16c] ss:$16 sps:$4 sm:$0xff]   ;;  %v1707_v18 = vld [vmem:[#allocation11 + $0x168] ss:$16 sps:$4 sm:$0xff]   ;;  %v1718_v23 = vld [vmem:[#allocation11 + $0x124] ss:$16 sps:$4 sm:$0xff]  }
 0x135   :  { %vm325_vm0 = vcmp.gt.f32.partialorder %v301_v28, 0.0  ;;  %v341_v33 = vmul.f32 0.15, %v301_v28  ;;  %v303_v34 = vadd.f32 %v302_v31, %v1949_v45  ;;  %618 = vmatmul.mubr.bf16.gmra.mxu1 %v365_v29  ;;  %v356_v48 = vsel %vm324_vm1, %v299_v20, %v340_v32  ;;  %v1715_v20 = vld [vmem:[#allocation11 + $0x14c] ss:$16 sps:$4 sm:$0xff]   ;;  %1234 = vmatprep.subr.bf16.mxu0 %v1718_v23 }
 0x136   :  { %v306_v36 = vpop.f32.mrf.mxu0  ;;  %1284 = vmatpush1.bf16.msra.mxu1 %v1647_v27  ;;  %v1713_v22 = vld [vmem:[#allocation11 + $0x148] ss:$16 sps:$4 sm:$0xff]   ;;  %v1721_v24 = vld [vmem:[#allocation11 + $0x12c] ss:$16 sps:$4 sm:$0xff]   ;;  %v1716_v25 = vld [vmem:[#allocation11 + $0x120] ss:$16 sps:$4 sm:$0xff]  }
 0x137   :  { %vm326_vm3 = vcmp.gt.f32.partialorder %v303_v34, 0.0  ;;  %v342_v38 = vmul.f32 0.15, %v303_v34  ;;  %1285 = vmatprep.subr.bf16.mxu1 %v1655_v30  ;;  %v357_v44 = vsel %vm325_vm0, %v301_v28, %v341_v33  ;;  %v307_v50 = vadd.f32 %v306_v36, %v1952_v46  ;;  %v1719_v26 = vld [vmem:[#allocation11 + $0x128] ss:$16 sps:$4 sm:$0xff]   ;;  %1235 = vmatpush2.bf16.msra.mxu0 %v1716_v25 }
 0x138   :  { %v308_v40 = vpop.f32.mrf.mxu0  ;;  %v367_v56 = vpack.c.bf16 %v357_v44, %v355_v53  ;;  %v1724_v27 = vld [vmem:[#allocation11 + $0x104] ss:$16 sps:$4 sm:$0xff]   ;;  %v1727_v28 = vld [vmem:[#allocation11 + $0x10c] ss:$16 sps:$4 sm:$0xff]   ;;  %v1722_v29 = vld [vmem:[#allocation11 + $0x100] ss:$16 sps:$4 sm:$0xff]  }
 0x139   :  { %v309_v47 = vadd.f32 %v308_v40, %v1949_v45  ;;  %v358_v49 = vsel %vm326_vm3, %v303_v34, %v342_v38  ;;  %v343_v62 = vmul.f32 0.15, %v307_v50  ;;  %vm327_vm6 = vcmp.gt.f32.partialorder %v307_v50, 0.0  ;;  %v1725_v30 = vld [vmem:[#allocation11 + $0x108] ss:$16 sps:$4 sm:$0xff]   ;;  %1236 = vmatprep.subr.bf16.mxu0 %v1724_v27 }
 0x13a   :  { %v310_v51 = vpop.f32.mrf.mxu0  ;;  %v368_v52 = vpack.c.bf16 %v358_v49, %v356_v48  ;;  %1286 = vmatpush1.bf16.msra.mxu1 %v1653_v37  ;;  %v403_v31 = vld [vmem:[#allocation9] sm:$0x3] }
 0x13b   :  { %v311_v55 = vadd.f32 %v310_v51, %v1952_v46  ;;  %1287 = vmatprep.subr.bf16.mxu1 %v1661_v39  ;;  %v344_v59 = vmul.f32 0.15, %v309_v47  ;;  %vm328_vm5 = vcmp.gt.f32.partialorder %v309_v47, 0.0  ;;  %v1673_v46 = vld [vmem:[#allocation11 + $0x2c] ss:$16 sps:$4 sm:$0xff]   ;;  %v359_v6 = vsel %vm327_vm6, %v307_v50, %v343_v62  ;;  %1237 = vmatpush2.bf16.msra.mxu0 %v1722_v29 }
 0x13c   :  { %v312_v58 = vpop.f32.mrf.mxu0  ;;  %627 = vmatprep.mubr.bf16.mxu1 %v368_v52  ;;  %v1971_v32 = vrot.slane %v403_v31, %v1940_v42  ;;  %v1974_v33 = vrot.slane %v403_v31, %v1943_v43 }
 0x13d   :  { %vm329_vm4 = vcmp.gt.f32.partialorder %v311_v55, 0.0  ;;  %v345_v60 = vmul.f32 0.15, %v311_v55  ;;  %v313_v61 = vadd.f32 %v312_v58, %v1949_v45  ;;  %628 = vmatmul.mubr.bf16.gmra.mxu1 %v367_v56  ;;  %v360_v3 = vsel %vm328_vm5, %v309_v47, %v344_v59  ;;  %v1679_v45 = vld [vmem:[#allocation11 + $0xc] ss:$16 sps:$4 sm:$0xff]  }
 0x13e   :  { %1288 = vmatpush1.bf16.msra.mxu1 %v1659_v54 }
 0x13f   :  { %vm330_vm7 = vcmp.gt.f32.partialorder %v313_v61, 0.0  ;;  %v346_v1 = vmul.f32 0.15, %v313_v61  ;;  %1289 = vmatprep.subr.bf16.mxu1 %v1667_v57  ;;  %v361_v2 = vsel %vm329_vm4, %v311_v55, %v345_v60 }
 0x140   :  { %v369_v8 = vpack.c.bf16 %v361_v2, %v359_v6 }
 0x141   :  { %v362_v4 = vsel %vm330_vm7, %v313_v61, %v346_v1 }
 0x142   :  { %v370_v5 = vpack.c.bf16 %v362_v4, %v360_v3  ;;  %1290 = vmatpush1.bf16.msra.mxu1 %v1665_v63 }
 0x143   :  { %1291 = vmatprep.subr.bf16.mxu1 %v1673_v46 }
 0x144   :  { %637 = vmatprep.mubr.bf16.mxu1 %v370_v5 }
 0x145   :  { %638 = vmatmul.mubr.bf16.gmra.mxu1 %v369_v8 }
 0x146   :  { %1292 = vmatpush1.bf16.msra.mxu1 %v1671_v7 }
 0x147   :  { %1293 = vmatprep.subr.bf16.mxu1 %v1679_v45 }
 0x14a   :  { %1294 = vmatpush1.bf16.msra.mxu1 %v1677_v0 }
 0x14b   :  { %1295 = vmatprep.subr.bf16.mxu1 %v1685_v9 }
 0x14e   :  { %1296 = vmatpush2.bf16.msra.mxu1 %v1683_v10 }
 0x14f   :  { %1297 = vmatprep.subr.bf16.mxu1 %v1691_v11 }
 0x152   :  { %1298 = vmatpush2.bf16.msra.mxu1 %v1689_v12 }
 0x153   :  { %1299 = vmatprep.subr.bf16.mxu1 %v1697_v13 }
 0x156   :  { %1300 = vmatpush2.bf16.msra.mxu1 %v1695_v14 }
 0x157   :  { %1301 = vmatprep.subr.bf16.mxu1 %v1703_v15 }
 0x15a   :  { %1302 = vmatpush2.bf16.msra.mxu1 %v1701_v16 }
 0x15b   :  { %1303 = vmatprep.subr.bf16.mxu1 %v1709_v17 }
 0x15e   :  { %1304 = vmatpush2.bf16.msra.mxu1 %v1707_v18 }
 0x15f   :  { %1305 = vmatprep.subr.bf16.mxu1 %v1715_v20 }
 0x162   :  { %1306 = vmatpush2.bf16.msra.mxu1 %v1713_v22 }
 0x163   :  { %1307 = vmatprep.subr.bf16.mxu1 %v1721_v24 }
 0x166   :  { %1308 = vmatpush2.bf16.msra.mxu1 %v1719_v26 }
 0x167   :  { %1309 = vmatprep.subr.bf16.mxu1 %v1727_v28 }
 0x16a   :  { %1310 = vmatpush2.bf16.msra.mxu1 %v1725_v30 }
 0x1ed   :  { %v609_v34 = vpop.f32.mrf.mxu1 }
 0x1ee   :  { %v610_v37 = vadd.f32 %v609_v34, %v1974_v33 }
 0x1ef   :  { %v611_v35 = vpop.f32.mrf.mxu1 }
 0x1f0   :  { %v612_v36 = vadd.f32 %v611_v35, %v1971_v32  ;;  %v664_v49 = vmul.f32 0.15, %v610_v37  ;;  %vm648_vm10 = vcmp.gt.f32.partialorder %v610_v37, 0.0 }
 0x1f1   :  { %v613_v38 = vpop.f32.mrf.mxu1 }
 0x1f2   :  { %v614_v39 = vadd.f32 %v613_v38, %v1974_v33  ;;  %v665_v44 = vmul.f32 0.15, %v612_v36  ;;  %vm649_vm9 = vcmp.gt.f32.partialorder %v612_v36, 0.0  ;;  %v680_v57 = vsel %vm648_vm10, %v610_v37, %v664_v49 }
 0x1f3   :  { %v615_v40 = vpop.f32.mrf.mxu1 }
 0x1f4   :  { %vm650_vm8 = vcmp.gt.f32.partialorder %v614_v39, 0.0  ;;  %v666_v47 = vmul.f32 0.15, %v614_v39  ;;  %v616_v48 = vadd.f32 %v615_v40, %v1971_v32  ;;  %v681_v55 = vsel %vm649_vm9, %v612_v36, %v665_v44 }
 0x1f5   :  { %v619_v50 = vpop.f32.mrf.mxu1 }
 0x1f6   :  { %vm651_vm11 = vcmp.gt.f32.partialorder %v616_v48, 0.0  ;;  %v667_v51 = vmul.f32 0.15, %v616_v48  ;;  %v682_v52 = vsel %vm650_vm8, %v614_v39, %v666_v47  ;;  %v620_v58 = vadd.f32 %v619_v50, %v1974_v33 }
 0x1f7   :  { %v621_v53 = vpop.f32.mrf.mxu1  ;;  %v1539_v61 = vpack.c.bf16 %v682_v52, %v680_v57  ;;  %v840_v52 = vsub.s32 3, %v1937_v41 }
 0x1f8   :  { %v622_v54 = vadd.f32 %v621_v53, %v1971_v32  ;;  %v683_v56 = vsel %vm651_vm11, %v616_v48, %v667_v51  ;;  %v668_v3 = vmul.f32 0.15, %v620_v58  ;;  %vm652_vm14 = vcmp.gt.f32.partialorder %v620_v58, 0.0 }
 0x1f9   :  { %v623_v59 = vpop.f32.mrf.mxu1  ;;  %v1540_v60 = vpack.c.bf16 %v683_v56, %v681_v55  ;;  %v836_v51 = vsub.s32 2, %v1937_v41 }
 0x1fa   :  { %v624_v62 = vadd.f32 %v623_v59, %v1974_v33  ;;  %v669_v1 = vmul.f32 0.15, %v622_v54  ;;  %vm653_vm13 = vcmp.gt.f32.partialorder %v622_v54, 0.0  ;;  %v684_v12 = vsel %vm652_vm14, %v620_v58, %v668_v3 }
 0x1fb   :  { %v625_v63 = vpop.f32.mrf.mxu1  ;;  %1238 = vmatprep.mubr.bf16.mxu0 %v1540_v60  ;;  %1311 = vmatprep.mubr.bf16.mxu1 %v1540_v60 }
 0x1fc   :  { %vm654_vm12 = vcmp.gt.f32.partialorder %v624_v62, 0.0  ;;  %v670_v46 = vmul.f32 0.15, %v624_v62  ;;  %v626_v2 = vadd.f32 %v625_v63, %v1971_v32  ;;  %1239 = vmatmul.mubr.bf16.vlgmr.msra.gmra.mxu0 %v1539_v61  ;;  %1312 = vmatmul.mubr.bf16.vlgmr.msra.gmra.mxu1 %v1539_v61  ;;  %v685_v45 = vsel %vm653_vm13, %v622_v54, %v669_v1 }
 0x1fd   :  { %v629_v4 = vpop.f32.mrf.mxu1 }
 0x1fe   :  { %vm655_vm15 = vcmp.gt.f32.partialorder %v626_v2, 0.0  ;;  %v671_v5 = vmul.f32 0.15, %v626_v2  ;;  %v686_v7 = vsel %vm654_vm12, %v624_v62, %v670_v46  ;;  %v630_v9 = vadd.f32 %v629_v4, %v1974_v33 }
 0x1ff   :  { %v631_v6 = vpop.f32.mrf.mxu1  ;;  %v1541_v14 = vpack.c.bf16 %v686_v7, %v684_v12 }
 0x200   :  { %v632_v8 = vadd.f32 %v631_v6, %v1971_v32  ;;  %v687_v0 = vsel %vm655_vm15, %v626_v2, %v671_v5  ;;  %v672_v19 = vmul.f32 0.15, %v630_v9  ;;  %vm656_vm2 = vcmp.gt.f32.partialorder %v630_v9, 0.0 }
 0x201   :  { %v633_v10 = vpop.f32.mrf.mxu1  ;;  %v1542_v11 = vpack.c.bf16 %v687_v0, %v685_v45 }
 0x202   :  { %v634_v13 = vadd.f32 %v633_v10, %v1974_v33  ;;  %v673_v16 = vmul.f32 0.15, %v632_v8  ;;  %vm657_vm1 = vcmp.gt.f32.partialorder %v632_v8, 0.0  ;;  %v688_v30 = vsel %vm656_vm2, %v630_v9, %v672_v19 }
 0x203   :  { %v635_v15 = vpop.f32.mrf.mxu1  ;;  %1248 = vmatprep.mubr.bf16.mxu0 %v1542_v11  ;;  %1321 = vmatprep.mubr.bf16.mxu1 %v1542_v11 }
 0x204   :  { %vm658_vm0 = vcmp.gt.f32.partialorder %v634_v13, 0.0  ;;  %v674_v17 = vmul.f32 0.15, %v634_v13  ;;  %v636_v18 = vadd.f32 %v635_v15, %v1971_v32  ;;  %1249 = vmatmul.mubr.bf16.gmra.mxu0 %v1541_v14  ;;  %1322 = vmatmul.mubr.bf16.gmra.mxu1 %v1541_v14  ;;  %v689_v25 = vsel %vm657_vm1, %v632_v8, %v673_v16 }
 0x205   :  { %v639_v20 = vpop.f32.mrf.mxu1 }
 0x206   :  { %vm659_vm3 = vcmp.gt.f32.partialorder %v636_v18, 0.0  ;;  %v675_v21 = vmul.f32 0.15, %v636_v18  ;;  %v690_v23 = vsel %vm658_vm0, %v634_v13, %v674_v17  ;;  %v640_v27 = vadd.f32 %v639_v20, %v1974_v33 }
 0x207   :  { %v641_v22 = vpop.f32.mrf.mxu1  ;;  %v1543_v34 = vpack.c.bf16 %v690_v23, %v688_v30 }
 0x208   :  { %v642_v24 = vadd.f32 %v641_v22, %v1971_v32  ;;  %v691_v26 = vsel %vm659_vm3, %v636_v18, %v675_v21  ;;  %v676_v39 = vmul.f32 0.15, %v640_v27  ;;  %vm660_vm6 = vcmp.gt.f32.partialorder %v640_v27, 0.0 }
 0x209   :  { %v643_v28 = vpop.f32.mrf.mxu1  ;;  %v1544_v29 = vpack.c.bf16 %v691_v26, %v689_v25 }
 0x20a   :  { %v644_v31 = vadd.f32 %v643_v28, %v1974_v33  ;;  %v677_v36 = vmul.f32 0.15, %v642_v24  ;;  %vm661_vm5 = vcmp.gt.f32.partialorder %v642_v24, 0.0  ;;  %v692_v49 = vsel %vm660_vm6, %v640_v27, %v676_v39 }
 0x20b   :  { %v645_v35 = vpop.f32.mrf.mxu1  ;;  %1258 = vmatprep.mubr.bf16.mxu0 %v1544_v29  ;;  %1331 = vmatprep.mubr.bf16.mxu1 %v1544_v29 }
 0x20c   :  { %vm662_vm4 = vcmp.gt.f32.partialorder %v644_v31, 0.0  ;;  %v678_v37 = vmul.f32 0.15, %v644_v31  ;;  %v646_v38 = vadd.f32 %v645_v35, %v1971_v32  ;;  %1259 = vmatmul.mubr.bf16.gmra.mxu0 %v1543_v34  ;;  %1332 = vmatmul.mubr.bf16.gmra.mxu1 %v1543_v34  ;;  %v693_v47 = vsel %vm661_vm5, %v642_v24, %v677_v36  ;;  %v824_v32 = vld [vmem:[%s2048_s6] sm:$0xf]  ;;  %s1866_s6 = smov [#allocation12]  }
 0x20d   :  { %v1998_v53 = vrot.slane %v824_v32, %v1943_v43  ;;  %v2000_v54 = vrot.slane %v824_v32, %v836_v51  ;;  %v2003_v55 = vrot.slane %v824_v32, %v1940_v42  ;;  %v2005_v56 = vrot.slane %v824_v32, %v840_v52  ;;  %s1389_s28 = sshll.u32 %s1866_s6, 4  ;;  %s1390_s28 = int_to_ptr.vmem [resolvable:$true] %s1389_s28 }
 0x20e   :  { %vm663_vm7 = vcmp.gt.f32.partialorder %v646_v38, 0.0  ;;  %v679_v40 = vmul.f32 0.15, %v646_v38  ;;  %v694_v44 = vsel %vm662_vm4, %v644_v31, %v678_v37  ;;  %s1828_s29 = scalar_lea.vmem %s1390_s28, 4096  ;;  %p1833_p12 = scmp.lt.s32.totalorder %s1390_s28, %s1390_s28 }
 0x20f   :  { %v1545_v50 = vpack.c.bf16 %v694_v44, %v692_v49  ;;  %p1829_p11 = scmp.ne.s32.totalorder %s1390_s28, %s1828_s29  ;;  %p1834_p13 = scmp.lt.s32.totalorder %s1828_s29, %s1828_s29 }
 0x210   :  { %v695_v48 = vsel %vm663_vm7, %v646_v38, %v679_v40 }
 0x211   :  { %v1546_v33 = vpack.c.bf16 %v695_v48, %v693_v47  ;;  %p1835_p0 = por %p1834_p13, %p1833_p12 }
 0x213   :  { %1268 = vmatprep.mubr.bf16.mxu0 %v1546_v33  ;;  %1341 = vmatprep.mubr.bf16.mxu1 %v1546_v33  ;;  %p1836_p1 = pnand %p1835_p0, %p1829_p11 }
 0x214   :  { %1269 = vmatmul.mubr.bf16.gmra.mxu0 %v1545_v50  ;;  %1342 = vmatmul.mubr.bf16.gmra.mxu1 %v1545_v50 }
 0x2bc   :  { %v1240_v57 = vpop.f32.mrf.mxu0  ;;  %v1313_v58 = vpop.f32.mrf.mxu1 }
 0x2bd   :  { %v1241_v59 = vadd.f32 %v1240_v57, %v1998_v53  ;;  %v1314_v60 = vadd.f32 %v1313_v58, %v2000_v54 }
 0x2be   :  { %v1242_v61 = vpop.f32.mrf.mxu0  ;;  %v1315_v62 = vpop.f32.mrf.mxu1 }
 0x2bf   :  { %1352 = vst [vmem:[#allocation12] sm:$0xff] %v1241_v59  ;;  %1354 = vst [vmem:[#allocation12 + $0x10] sm:$0xff] %v1314_v60  ;;  %v1243_v41 = vadd.f32 %v1242_v61, %v2003_v55  ;;  %v1316_v43 = vadd.f32 %v1315_v62, %v2005_v56 }
 0x2c0   :  { %v1244_v63 = vpop.f32.mrf.mxu0  ;;  %v1317_v1 = vpop.f32.mrf.mxu1 }
 0x2c1   :  { %1353 = vst [vmem:[#allocation12 + $0x8] sm:$0xff] %v1243_v41  ;;  %1355 = vst [vmem:[#allocation12 + $0x18] sm:$0xff] %v1316_v43  ;;  %v1245_v42 = vadd.f32 %v1244_v63, %v1998_v53  ;;  %v1318_v46 = vadd.f32 %v1317_v1, %v2000_v54 }
 0x2c2   :  { %v1246_v2 = vpop.f32.mrf.mxu0  ;;  %v1319_v3 = vpop.f32.mrf.mxu1 }
 0x2c3   :  { %1356 = vst [vmem:[#allocation12 + $0x20] sm:$0xff] %v1245_v42  ;;  %1358 = vst [vmem:[#allocation12 + $0x30] sm:$0xff] %v1318_v46  ;;  %v1247_v4 = vadd.f32 %v1246_v2, %v2003_v55  ;;  %v1320_v5 = vadd.f32 %v1319_v3, %v2005_v56 }
 0x2c4   :  { %v1250_v6 = vpop.f32.mrf.mxu0  ;;  %v1323_v7 = vpop.f32.mrf.mxu1 }
 0x2c5   :  { %1357 = vst [vmem:[#allocation12 + $0x28] sm:$0xff] %v1247_v4  ;;  %1359 = vst [vmem:[#allocation12 + $0x38] sm:$0xff] %v1320_v5  ;;  %v1251_v8 = vadd.f32 %v1250_v6, %v1998_v53  ;;  %v1324_v45 = vadd.f32 %v1323_v7, %v2000_v54 }
 0x2c6   :  { %v1252_v0 = vpop.f32.mrf.mxu0  ;;  %v1325_v9 = vpop.f32.mrf.mxu1 }
 0x2c7   :  { %1360 = vst [vmem:[#allocation12 + $0x40] sm:$0xff] %v1251_v8  ;;  %1362 = vst [vmem:[#allocation12 + $0x50] sm:$0xff] %v1324_v45  ;;  %v1253_v10 = vadd.f32 %v1252_v0, %v2003_v55  ;;  %v1326_v11 = vadd.f32 %v1325_v9, %v2005_v56 }
 0x2c8   :  { %v1254_v12 = vpop.f32.mrf.mxu0  ;;  %v1327_v13 = vpop.f32.mrf.mxu1 }
 0x2c9   :  { %1361 = vst [vmem:[#allocation12 + $0x48] sm:$0xff] %v1253_v10  ;;  %1363 = vst [vmem:[#allocation12 + $0x58] sm:$0xff] %v1326_v11  ;;  %v1255_v14 = vadd.f32 %v1254_v12, %v1998_v53  ;;  %v1328_v15 = vadd.f32 %v1327_v13, %v2000_v54 }
 0x2ca   :  { %v1256_v16 = vpop.f32.mrf.mxu0  ;;  %v1329_v17 = vpop.f32.mrf.mxu1 }
 0x2cb   :  { %1364 = vst [vmem:[#allocation12 + $0x60] sm:$0xff] %v1255_v14  ;;  %1366 = vst [vmem:[#allocation12 + $0x70] sm:$0xff] %v1328_v15  ;;  %v1257_v18 = vadd.f32 %v1256_v16, %v2003_v55  ;;  %v1330_v19 = vadd.f32 %v1329_v17, %v2005_v56 }
 0x2cc   :  { %v1260_v20 = vpop.f32.mrf.mxu0  ;;  %v1333_v21 = vpop.f32.mrf.mxu1 }
 0x2cd   :  { %1365 = vst [vmem:[#allocation12 + $0x68] sm:$0xff] %v1257_v18  ;;  %1367 = vst [vmem:[#allocation12 + $0x78] sm:$0xff] %v1330_v19  ;;  %v1261_v22 = vadd.f32 %v1260_v20, %v1998_v53  ;;  %v1334_v23 = vadd.f32 %v1333_v21, %v2000_v54 }
 0x2ce   :  { %v1262_v24 = vpop.f32.mrf.mxu0  ;;  %v1335_v25 = vpop.f32.mrf.mxu1 }
 0x2cf   :  { %1368 = vst [vmem:[#allocation12 + $0x80] sm:$0xff] %v1261_v22  ;;  %1370 = vst [vmem:[#allocation12 + $0x90] sm:$0xff] %v1334_v23  ;;  %v1263_v26 = vadd.f32 %v1262_v24, %v2003_v55  ;;  %v1336_v27 = vadd.f32 %v1335_v25, %v2005_v56 }
 0x2d0   :  { %v1264_v28 = vpop.f32.mrf.mxu0  ;;  %v1337_v29 = vpop.f32.mrf.mxu1 }
 0x2d1   :  { %1369 = vst [vmem:[#allocation12 + $0x88] sm:$0xff] %v1263_v26  ;;  %1371 = vst [vmem:[#allocation12 + $0x98] sm:$0xff] %v1336_v27  ;;  %v1265_v30 = vadd.f32 %v1264_v28, %v1998_v53  ;;  %v1338_v31 = vadd.f32 %v1337_v29, %v2000_v54 }
 0x2d2   :  { %v1266_v34 = vpop.f32.mrf.mxu0  ;;  %v1339_v35 = vpop.f32.mrf.mxu1 }
 0x2d3   :  { %1372 = vst [vmem:[#allocation12 + $0xa0] sm:$0xff] %v1265_v30  ;;  %1374 = vst [vmem:[#allocation12 + $0xb0] sm:$0xff] %v1338_v31  ;;  %v1267_v36 = vadd.f32 %v1266_v34, %v2003_v55  ;;  %v1340_v37 = vadd.f32 %v1339_v35, %v2005_v56 }
 0x2d4   :  { %v1270_v38 = vpop.f32.mrf.mxu0  ;;  %v1343_v39 = vpop.f32.mrf.mxu1 }
 0x2d5   :  { %1373 = vst [vmem:[#allocation12 + $0xa8] sm:$0xff] %v1267_v36  ;;  %1375 = vst [vmem:[#allocation12 + $0xb8] sm:$0xff] %v1340_v37  ;;  %v1271_v40 = vadd.f32 %v1270_v38, %v1998_v53  ;;  %v1344_v44 = vadd.f32 %v1343_v39, %v2000_v54 }
 0x2d6   :  { %v1272_v47 = vpop.f32.mrf.mxu0  ;;  %v1345_v48 = vpop.f32.mrf.mxu1 }
 0x2d7   :  { %1376 = vst [vmem:[#allocation12 + $0xc0] sm:$0xff] %v1271_v40  ;;  %1378 = vst [vmem:[#allocation12 + $0xd0] sm:$0xff] %v1344_v44  ;;  %v1273_v33 = vadd.f32 %v1272_v47, %v2003_v55  ;;  %v1346_v49 = vadd.f32 %v1345_v48, %v2005_v56 }
 0x2d8   :  { %v1274_v50 = vpop.f32.mrf.mxu0  ;;  %v1347_v51 = vpop.f32.mrf.mxu1 }
 0x2d9   :  { %1377 = vst [vmem:[#allocation12 + $0xc8] sm:$0xff] %v1273_v33  ;;  %1379 = vst [vmem:[#allocation12 + $0xd8] sm:$0xff] %v1346_v49  ;;  %v1275_v32 = vadd.f32 %v1274_v50, %v1998_v53  ;;  %v1348_v52 = vadd.f32 %v1347_v51, %v2000_v54 }
 0x2da   :  { %v1276_v57 = vpop.f32.mrf.mxu0  ;;  %v1349_v58 = vpop.f32.mrf.mxu1 }
 0x2db   :  { %1380 = vst [vmem:[#allocation12 + $0xe0] sm:$0xff] %v1275_v32  ;;  %1382 = vst [vmem:[#allocation12 + $0xf0] sm:$0xff] %v1348_v52  ;;  %v1277_v59 = vadd.f32 %v1276_v57, %v2003_v55  ;;  %v1350_v60 = vadd.f32 %v1349_v58, %v2005_v56 }
 0x2dd   :  { %1381 = vst [vmem:[#allocation12 + $0xe8] sm:$0xff] %v1277_v59  ;;  %1383 = vst [vmem:[#allocation12 + $0xf8] sm:$0xff] %v1350_v60 }
 0x2de   :  { %1839 = shalt.err (!%p1836_p1)
}
 0x2df   :  { %s1867_s30 = smov 512   ;;  %s1868_s8 = smov 32  }
 0x2e0   :  { %1395 = dma.vmem_to_hbm [thread:$0]  %s1390_s28, 4096, %s2049_s7, [#allocation5], %s1867_s30, %s1867_s30, %s1868_s8  }
 0x2e1   :  { %1854 = dma.done.wait [#allocation5], 4096  }
 0x2e2   :  { %1855 = vsyncadd [#allocation5], 4294963200 }
 0x2e3   :  { %1399 = vsyncpa [#allocation4], 1 }
 0x2e4   :  { %1400 = vsyncpa [#allocation7], 1 }
 0x2e5   :  { %1401 = vsyncpa [#allocation10], 1 }
 0x2e6   :  { %1402 = vsyncpa [#allocation5], 1 }

// kernel: tpu_custom_call.1
= control target key start
LH: loop header
LB: loop body
LE: loop exit
PB: predicated region body
PF: predicated region fallthrough
CT: control target
= control target key end

     0   :  { %12 = vsyncpa [#allocation4], 0  ;;  %s2042_s0 = inlined_call_operand.hbm [shape: f32[64,128], index: 0, kind: input, shape index: {}]   ;;  %s2043_s1 = inlined_call_operand.hbm [shape: bf16[128,256], index: 1, kind: input, shape index: {}]   ;;  %s2044_s2 = inlined_call_operand.vmem [shape: f32[1,256], index: 2, kind: input, shape index: {}]   ;;  %s2045_s3 = inlined_call_operand.hbm [shape: bf16[256,256], index: 3, kind: input, shape index: {}]   ;;  %s2046_s4 = inlined_call_operand.hbm [shape: f32[1,256], index: 4, kind: input, shape index: {}]   ;;  %s2047_s5 = inlined_call_operand.hbm [shape: bf16[256,512], index: 5, kind: input, shape index: {}]   ;;  %s2048_s6 = inlined_call_operand.vmem [shape: f32[1,512], index: 6, kind: input, shape index: {}]   ;;  %s2049_s7 = inlined_call_operand.hbm [shape: f32[64,512], index: 7, kind: output, shape index: {}]  }
   0x1   :  { %13 = vsyncpa [#allocation7], 0 }
   0x2   :  { %14 = vsyncpa [#allocation10], 0 }
   0x3   :  { %15 = vsyncpa [#allocation5], 0  ;;  %s1856_s24 = smov [#allocation6]   ;;  %s1857_s26 = smov [#allocation9]  }
   0x4   :  { %s33_s25 = sshll.u32 %s1856_s24, 4  ;;  %s60_s27 = sshll.u32 %s1857_s26, 4  ;;  %s34_s25 = int_to_ptr.vmem [resolvable:$true] %s33_s25  ;;  %s61_s27 = int_to_ptr.vmem [resolvable:$true] %s60_s27 }
   0x5   :  { %s1736_s28 = scalar_lea.vmem %s34_s25, 2048  ;;  %p1741_p1 = scmp.lt.s32.totalorder %s34_s25, %s34_s25 }
   0x6   :  { %p1737_p0 = scmp.ne.s32.totalorder %s34_s25, %s1736_s28  ;;  %p1742_p2 = scmp.lt.s32.totalorder %s1736_s28, %s1736_s28 }
   0x8   :  { %p1743_p3 = por %p1742_p2, %p1741_p1 }
   0xa   :  { %p1744_p4 = pnand %p1743_p3, %p1737_p0 }
   0xc   :  { %1747 = shalt.err (!%p1744_p4)
}
   0xd   :  { %s1858_s29 = smov 128   ;;  %s1859_s30 = smov 8  }
   0xe   :  { %39 = dma.hbm_to_vmem [thread:$0]  %s2043_s1, 2048, %s34_s25, [#allocation7], %s1858_s29, %s1858_s29, %s1859_s30  }
   0xf   :  { %s1756_s10 = scalar_lea.vmem %s61_s27, 32  ;;  %p1761_p6 = scmp.lt.s32.totalorder %s61_s27, %s61_s27 }
  0x10   :  { %p1757_p5 = scmp.ne.s32.totalorder %s61_s27, %s1756_s10  ;;  %p1762_p7 = scmp.lt.s32.totalorder %s1756_s10, %s1756_s10 }
  0x12   :  { %p1763_p8 = por %p1762_p7, %p1761_p6 }
  0x14   :  { %p1764_p9 = pnand %p1763_p8, %p1757_p5 }
  0x16   :  { %1767 = shalt.err (!%p1764_p9)
}
  0x17   :  { %63 = dma.hbm_to_vmem [thread:$0]  %s2046_s4, 32, %s61_s27, [#allocation10]  }
  0x18   :  { %s1860_s13 = smov [#allocation3]   ;;  %s1861_s15 = smov [#allocation8]  }
  0x19   :  { %s21_s14 = sshll.u32 %s1860_s13, 4  ;;  %s47_s16 = sshll.u32 %s1861_s15, 4  ;;  %s22_s14 = int_to_ptr.vmem [resolvable:$true] %s21_s14  ;;  %s48_s16 = int_to_ptr.vmem [resolvable:$true] %s47_s16 }
  0x1a   :  { %s1776_s17 = scalar_lea.vmem %s22_s14, 1024  ;;  %p1781_p11 = scmp.lt.s32.totalorder %s22_s14, %s22_s14 }
  0x1b   :  { %p1777_p10 = scmp.ne.s32.totalorder %s22_s14, %s1776_s17  ;;  %p1782_p12 = scmp.lt.s32.totalorder %s1776_s17, %s1776_s17 }
  0x1d   :  { %p1783_p13 = por %p1782_p12, %p1781_p11 }
  0x1f   :  { %p1784_p0 = pnand %p1783_p13, %p1777_p10 }
  0x21   :  { %1787 = shalt.err (!%p1784_p0)
}
  0x22   :  { %27 = dma.hbm_to_vmem [thread:$0]  %s2042_s0, 1024, %s22_s14, [#allocation4], %s1858_s29, %s1858_s29, %s1859_s30  }
  0x23   :  { %s1796_s4 = scalar_lea.vmem %s48_s16, 4096  ;;  %p1801_p2 = scmp.lt.s32.totalorder %s48_s16, %s48_s16 }
  0x24   :  { %p1797_p1 = scmp.ne.s32.totalorder %s48_s16, %s1796_s4  ;;  %p1802_p3 = scmp.lt.s32.totalorder %s1796_s4, %s1796_s4 }
  0x26   :  { %p1803_p4 = por %p1802_p3, %p1801_p2 }
  0x28   :  { %p1804_p5 = pnand %p1803_p4, %p1797_p1 }
  0x2a   :  { %1807 = shalt.err (!%p1804_p5)
}
  0x2b   :  { %53 = dma.hbm_to_vmem [thread:$0]  %s2045_s3, 4096, %s48_s16, [#allocation7], %s1858_s29, %s1858_s29, %s1859_s30  }
  0x2c   :  { %s1862_s21 = smov [#allocation11]  }
  0x2d   :  { %s69_s22 = sshll.u32 %s1862_s21, 4  ;;  %s70_s22 = int_to_ptr.vmem [resolvable:$true] %s69_s22 }
  0x2e   :  { %s1816_s23 = scalar_lea.vmem %s70_s22, 8192  ;;  %p1821_p7 = scmp.lt.s32.totalorder %s70_s22, %s70_s22 }
  0x2f   :  { %p1817_p6 = scmp.ne.s32.totalorder %s70_s22, %s1816_s23  ;;  %p1822_p8 = scmp.lt.s32.totalorder %s1816_s23, %s1816_s23 }
  0x31   :  { %p1823_p9 = por %p1822_p8, %p1821_p7 }
  0x33   :  { %p1824_p10 = pnand %p1823_p9, %p1817_p6 }
  0x35   :  { %1827 = shalt.err (!%p1824_p10)
}
  0x36   :  { %s1863_s0 = smov 256   ;;  %s1864_s24 = smov 16  }
  0x37   :  { %75 = dma.hbm_to_vmem [thread:$0]  %s2047_s5, 8192, %s70_s22, [#allocation10], %s1863_s0, %s1863_s0, %s1864_s24  }
  0x38   :  { %1848 = dma.done.wait [#allocation4], 1024  }
  0x39   :  { %1849 = vsyncadd [#allocation4], 4294966272 }
  0x3a   :  { %1850 = dma.done.wait [#allocation7], 6144  }
  0x3b   :  { %1851 = vsyncadd [#allocation7], 4294961152 }
  0x3c   :  { %1852 = dma.done.wait [#allocation10], 8224  }
  0x3d   :  { %1853 = vsyncadd [#allocation10], 4294959072  ;;  %v1865_v0 = vmov 0   ;;  %v1560_v1 = vld [vmem:[#allocation6 + $0x74] ss:$8 sps:$4 sm:$0xff]   ;;  %v98_v17 = vld [vmem:[#allocation3] sm:$0xff] }
  0x3e   :  { %274 = vmatprep.mubr.bf16.mxu0 %v1865_v0  ;;  %v1562_v2 = vld [vmem:[#allocation6 + $0x70] ss:$8 sps:$4 sm:$0xff]   ;;  %242 = vmatprep.subr.bf16.mxu0 %v1560_v1  ;;  %v1563_v3 = vld [vmem:[#allocation6 + $0x64] ss:$8 sps:$4 sm:$0xff]   ;;  %v1565_v4 = vld [vmem:[#allocation6 + $0x60] ss:$8 sps:$4 sm:$0xff]  }
  0x3f   :  { %243 = vmatpush1.bf16.msra.mxu0 %v1562_v2  ;;  %v1566_v5 = vld [vmem:[#allocation6 + $0x54] ss:$8 sps:$4 sm:$0xff]   ;;  %v1568_v6 = vld [vmem:[#allocation6 + $0x50] ss:$8 sps:$4 sm:$0xff]   ;;  %v1569_v7 = vld [vmem:[#allocation6 + $0x44] ss:$8 sps:$4 sm:$0xff]  }
  0x40   :  { %244 = vmatprep.subr.bf16.mxu0 %v1563_v3  ;;  %v1571_v8 = vld [vmem:[#allocation6 + $0x40] ss:$8 sps:$4 sm:$0xff]   ;;  %v1572_v9 = vld [vmem:[#allocation6 + $0x34] ss:$8 sps:$4 sm:$0xff]   ;;  %v1574_v10 = vld [vmem:[#allocation6 + $0x30] ss:$8 sps:$4 sm:$0xff]  }
  0x41   :  { %v1575_v11 = vld [vmem:[#allocation6 + $0x24] ss:$8 sps:$4 sm:$0xff]   ;;  %v1584_v12 = vld [vmem:[#allocation8 + $0x74] ss:$8 sps:$4 sm:$0xff]   ;;  %v1586_v13 = vld [vmem:[#allocation8 + $0x70] ss:$8 sps:$4 sm:$0xff]  }
  0x42   :  { %v1577_v14 = vld [vmem:[#allocation6 + $0x20] ss:$8 sps:$4 sm:$0xff]   ;;  %v1578_v15 = vld [vmem:[#allocation6 + $0x14] ss:$8 sps:$4 sm:$0xff]   ;;  %575 = vmatprep.subr.bf16.mxu1 %v1584_v12  ;;  %v1587_v16 = vld [vmem:[#allocation8 + $0x64] ss:$8 sps:$4 sm:$0xff]  }
  0x43   :  { %245 = vmatpush1.bf16.msra.mxu0 %v1565_v4  ;;  %576 = vmatpush1.bf16.msra.mxu1 %v1586_v13  ;;  %v1589_v18 = vld [vmem:[#allocation8 + $0x60] ss:$8 sps:$4 sm:$0xff]   ;;  %v1590_v20 = vld [vmem:[#allocation8 + $0x54] ss:$8 sps:$4 sm:$0xff]   ;;  %v1580_v21 = vld [vmem:[#allocation6 + $0x10] ss:$8 sps:$4 sm:$0xff]  }
  0x44   :  { %246 = vmatprep.subr.bf16.mxu0 %v1566_v5  ;;  %v99_v19 = vld [vmem:[#allocation3 + $0x8] sm:$0xff]  ;;  %577 = vmatprep.subr.bf16.mxu1 %v1587_v16  ;;  %v114_v23 = vmul.f32 0.15, %v98_v17  ;;  %v1592_v25 = vld [vmem:[#allocation8 + $0x50] ss:$8 sps:$4 sm:$0xff]   ;;  %vm106_vm0 = vcmp.gt.f32.partialorder %v98_v17, 0.0 }
  0x45   :  { %v1581_v22 = vld [vmem:[#allocation6 + $0x4] ss:$8 sps:$4 sm:$0xff]   ;;  %v115_v24 = vmul.f32 0.15, %v99_v19  ;;  %vm107_vm1 = vcmp.gt.f32.partialorder %v99_v19, 0.0  ;;  %v100_v30 = vld [vmem:[#allocation3 + $0x10] sm:$0xff] }
  0x46   :  { %v1593_v26 = vld [vmem:[#allocation8 + $0x44] ss:$8 sps:$4 sm:$0xff]   ;;  %v1583_v27 = vld [vmem:[#allocation6] ss:$8 sps:$4 sm:$0xff]   ;;  %v122_v28 = vsel %vm106_vm0, %v98_v17, %v114_v23  ;;  %v101_v32 = vld [vmem:[#allocation3 + $0x18] sm:$0xff]  ;;  %vm108_vm2 = vcmp.gt.f32.partialorder %v100_v30, 0.0 }
  0x47   :  { %247 = vmatpush1.bf16.msra.mxu0 %v1568_v6  ;;  %578 = vmatpush1.bf16.msra.mxu1 %v1589_v18  ;;  %v123_v29 = vsel %vm107_vm1, %v99_v19, %v115_v24  ;;  %v1595_v31 = vld [vmem:[#allocation8 + $0x40] ss:$8 sps:$4 sm:$0xff]   ;;  %v1596_v33 = vld [vmem:[#allocation8 + $0x34] ss:$8 sps:$4 sm:$0xff]   ;;  %v116_v35 = vmul.f32 0.15, %v100_v30 }
  0x48   :  { %248 = vmatprep.subr.bf16.mxu0 %v1569_v7  ;;  %579 = vmatprep.subr.bf16.mxu1 %v1590_v20  ;;  %v130_v34 = vpack.c.bf16 %v123_v29, %v122_v28  ;;  %v117_v36 = vmul.f32 0.15, %v101_v32  ;;  %v1598_v37 = vld [vmem:[#allocation8 + $0x30] ss:$8 sps:$4 sm:$0xff]   ;;  %vm109_vm3 = vcmp.gt.f32.partialorder %v101_v32, 0.0  ;;  %v102_v39 = vld [vmem:[#allocation3 + $0x20] sm:$0xff] }
  0x49   :  { %v1599_v38 = vld [vmem:[#allocation8 + $0x24] ss:$8 sps:$4 sm:$0xff]   ;;  %v1601_v40 = vld [vmem:[#allocation8 + $0x20] ss:$8 sps:$4 sm:$0xff]   ;;  %v1602_v42 = vld [vmem:[#allocation8 + $0x14] ss:$8 sps:$4 sm:$0xff]   ;;  %v124_v43 = vsel %vm108_vm2, %v100_v30, %v116_v35 }
  0x4a   :  { %v103_v41 = vld [vmem:[#allocation3 + $0x28] sm:$0xff]  ;;  %v125_v44 = vsel %vm109_vm3, %v101_v32, %v117_v36  ;;  %v1604_v45 = vld [vmem:[#allocation8 + $0x10] ss:$8 sps:$4 sm:$0xff]   ;;  %v118_v47 = vmul.f32 0.15, %v102_v39  ;;  %vm110_vm4 = vcmp.gt.f32.partialorder %v102_v39, 0.0 }
  0x4b   :  { %249 = vmatpush1.bf16.msra.mxu0 %v1571_v8  ;;  %580 = vmatpush1.bf16.msra.mxu1 %v1592_v25  ;;  %v131_v46 = vpack.c.bf16 %v125_v44, %v124_v43  ;;  %v1605_v48 = vld [vmem:[#allocation8 + $0x4] ss:$8 sps:$4 sm:$0xff]   ;;  %v119_v49 = vmul.f32 0.15, %v103_v41  ;;  %vm111_vm5 = vcmp.gt.f32.partialorder %v103_v41, 0.0  ;;  %v104_v50 = vld [vmem:[#allocation3 + $0x30] sm:$0xff] }
  0x4c   :  { %250 = vmatprep.subr.bf16.mxu0 %v1572_v9  ;;  %581 = vmatprep.subr.bf16.mxu1 %v1593_v26  ;;  %v1607_v51 = vld [vmem:[#allocation8] ss:$8 sps:$4 sm:$0xff]   ;;  %v105_v52 = vld [vmem:[#allocation3 + $0x38] sm:$0xff]  ;;  %v126_v54 = vsel %vm110_vm4, %v102_v39, %v118_v47  ;;  %v120_v58 = vmul.f32 0.15, %v104_v50  ;;  %vm112_vm6 = vcmp.gt.f32.partialorder %v104_v50, 0.0 }
  0x4d   :  { %v1608_v53 = vld [vmem:[#allocation8 + $0xf4] ss:$8 sps:$4 sm:$0xff]   ;;  %v127_v55 = vsel %vm111_vm5, %v103_v41, %v119_v49  ;;  %v1610_v56 = vld [vmem:[#allocation8 + $0xf0] ss:$8 sps:$4 sm:$0xff]   ;;  %v1611_v59 = vld [vmem:[#allocation8 + $0xe4] ss:$8 sps:$4 sm:$0xff]  }
  0x4e   :  { %v132_v57 = vpack.c.bf16 %v127_v55, %v126_v54  ;;  %v121_v60 = vmul.f32 0.15, %v105_v52  ;;  %vm113_vm7 = vcmp.gt.f32.partialorder %v105_v52, 0.0  ;;  %v1613_v61 = vld [vmem:[#allocation8 + $0xe0] ss:$8 sps:$4 sm:$0xff]   ;;  %v128_v63 = vsel %vm112_vm6, %v104_v50, %v120_v58 }
  0x4f   :  { %251 = vmatpush1.bf16.msra.mxu0 %v1574_v10  ;;  %582 = vmatpush1.bf16.msra.mxu1 %v1595_v31  ;;  %v1614_v62 = vld [vmem:[#allocation8 + $0xd4] ss:$8 sps:$4 sm:$0xff]   ;;  %v1616_v2 = vld [vmem:[#allocation8 + $0xd0] ss:$8 sps:$4 sm:$0xff]   ;;  %v1617_v4 = vld [vmem:[#allocation8 + $0xc4] ss:$8 sps:$4 sm:$0xff]  }
  0x50   :  { %252 = vmatprep.subr.bf16.mxu0 %v1575_v11  ;;  %583 = vmatprep.subr.bf16.mxu1 %v1596_v33  ;;  %v129_v1 = vsel %vm113_vm7, %v105_v52, %v121_v60  ;;  %v1619_v5 = vld [vmem:[#allocation8 + $0xc0] ss:$8 sps:$4 sm:$0xff]   ;;  %v1620_v6 = vld [vmem:[#allocation8 + $0xb4] ss:$8 sps:$4 sm:$0xff]   ;;  %v1622_v7 = vld [vmem:[#allocation8 + $0xb0] ss:$8 sps:$4 sm:$0xff]  }
  0x51   :  { %v133_v3 = vpack.c.bf16 %v129_v1, %v128_v63  ;;  %v1623_v8 = vld [vmem:[#allocation8 + $0xa4] ss:$8 sps:$4 sm:$0xff]   ;;  %v1626_v9 = vld [vmem:[#allocation8 + $0x94] ss:$8 sps:$4 sm:$0xff]   ;;  %v1628_v10 = vld [vmem:[#allocation8 + $0x90] ss:$8 sps:$4 sm:$0xff]  }
  0x52   :  { %v1629_v11 = vld [vmem:[#allocation8 + $0x84] ss:$8 sps:$4 sm:$0xff]   ;;  %v1631_v12 = vld [vmem:[#allocation8 + $0x80] ss:$8 sps:$4 sm:$0xff]  }
  0x53   :  { %253 = vmatpush1.bf16.msra.mxu0 %v1577_v14  ;;  %584 = vmatpush1.bf16.msra.mxu1 %v1598_v37  ;;  %v1632_v13 = vld [vmem:[#allocation11 + $0xe0] ss:$16 sps:$4 sm:$0xff]   ;;  %v1634_v14 = vld [vmem:[#allocation11 + $0xe4] ss:$16 sps:$4 sm:$0xff]   ;;  %v150_v44 = vld [vmem:[%s2044_s2] sm:$0x3] }
  0x54   :  { %254 = vmatprep.subr.bf16.mxu0 %v1578_v15  ;;  %585 = vmatprep.subr.bf16.mxu1 %v1599_v38  ;;  %v1637_v15 = vld [vmem:[#allocation11 + $0xec] ss:$16 sps:$4 sm:$0xff]   ;;  %v1640_v16 = vld [vmem:[#allocation11 + $0xc4] ss:$16 sps:$4 sm:$0xff]   ;;  %v1638_v17 = vld [vmem:[#allocation11 + $0xc0] ss:$16 sps:$4 sm:$0xff]  }
  0x55   :  { %v1646_v18 = vld [vmem:[#allocation11 + $0xa4] ss:$16 sps:$4 sm:$0xff]   ;;  %v1644_v19 = vld [vmem:[#allocation11 + $0xa0] ss:$16 sps:$4 sm:$0xff]  }
  0x56   :  { %v1652_v20 = vld [vmem:[#allocation11 + $0x84] ss:$16 sps:$4 sm:$0xff]   ;;  %v1656_v23 = vld [vmem:[#allocation11 + $0x60] ss:$16 sps:$4 sm:$0xff]  }
  0x57   :  { %255 = vmatpush1.bf16.msra.mxu0 %v1580_v21  ;;  %586 = vmatpush1.bf16.msra.mxu1 %v1601_v40  ;;  %v1650_v21 = vld [vmem:[#allocation11 + $0x80] ss:$16 sps:$4 sm:$0xff]   ;;  %v1664_v24 = vld [vmem:[#allocation11 + $0x44] ss:$16 sps:$4 sm:$0xff]   ;;  %v152_v40 = vlaneseq }
  0x58   :  { %256 = vmatprep.subr.bf16.mxu0 %v1581_v22  ;;  %587 = vmatprep.subr.bf16.mxu1 %v1602_v42  ;;  %v1658_v22 = vld [vmem:[#allocation11 + $0x64] ss:$16 sps:$4 sm:$0xff]   ;;  %v1662_v25 = vld [vmem:[#allocation11 + $0x40] ss:$16 sps:$4 sm:$0xff]  }
  0x59   :  { %v1670_v26 = vld [vmem:[#allocation11 + $0x24] ss:$16 sps:$4 sm:$0xff]   ;;  %v1674_v29 = vld [vmem:[#allocation11] ss:$16 sps:$4 sm:$0xff]   ;;  %v1937_v41 = vshrl.u32 %v152_v40, 7 }
  0x5a   :  { %v1676_v28 = vld [vmem:[#allocation11 + $0x4] ss:$16 sps:$4 sm:$0xff]   ;;  %v1680_v31 = vld [vmem:[#allocation11 + $0x1e0] ss:$16 sps:$4 sm:$0xff]  }
  0x5b   :  { %257 = vmatpush1.bf16.msra.mxu0 %v1583_v27  ;;  %588 = vmatpush1.bf16.msra.mxu1 %v1604_v45  ;;  %v1668_v27 = vld [vmem:[#allocation11 + $0x20] ss:$16 sps:$4 sm:$0xff]   ;;  %v1682_v30 = vld [vmem:[#allocation11 + $0x1e4] ss:$16 sps:$4 sm:$0xff]   ;;  %v1940_v42 = vsub.s32 1, %v1937_v41  ;;  %v1943_v43 = vsub.s32 0, %v1937_v41 }
  0x5c   :  { %589 = vmatprep.subr.bf16.mxu1 %v1605_v48  ;;  %1206 = vmatprep.subr.bf16.mxu0 %v1634_v14  ;;  %v1688_v32 = vld [vmem:[#allocation11 + $0x1c4] ss:$16 sps:$4 sm:$0xff]   ;;  %v1686_v33 = vld [vmem:[#allocation11 + $0x1c0] ss:$16 sps:$4 sm:$0xff]  }
  0x5d   :  { %v1692_v35 = vld [vmem:[#allocation11 + $0x1a0] ss:$16 sps:$4 sm:$0xff]   ;;  %v1700_v36 = vld [vmem:[#allocation11 + $0x184] ss:$16 sps:$4 sm:$0xff]   ;;  %v1949_v45 = vrot.slane %v150_v44, %v1940_v42 }
  0x5e   :  { %275 = vmatmul.mubr.bf16.vlgmr.msra.gmra.mxu0 %v130_v34  ;;  %v1694_v34 = vld [vmem:[#allocation11 + $0x1a4] ss:$16 sps:$4 sm:$0xff]   ;;  %v1698_v37 = vld [vmem:[#allocation11 + $0x180] ss:$16 sps:$4 sm:$0xff]  }
  0x5f   :  { %284 = vmatprep.mubr.bf16.mxu0 %v1865_v0  ;;  %590 = vmatpush1.bf16.msra.mxu1 %v1607_v51  ;;  %v1706_v38 = vld [vmem:[#allocation11 + $0x164] ss:$16 sps:$4 sm:$0xff]   ;;  %v1704_v39 = vld [vmem:[#allocation11 + $0x160] ss:$16 sps:$4 sm:$0xff]  }
  0x60   :  { %591 = vmatprep.subr.bf16.mxu1 %v1608_v53  ;;  %1207 = vmatpush1.bf16.msra.mxu0 %v1632_v13 }
  0x61   :  { %1208 = vmatprep.subr.bf16.mxu0 %v1640_v16 }
  0x63   :  { %592 = vmatpush2.bf16.msra.mxu1 %v1610_v56 }
  0x64   :  { %593 = vmatprep.subr.bf16.mxu1 %v1611_v59  ;;  %1209 = vmatpush1.bf16.msra.mxu0 %v1638_v17  ;;  %v1649_v17 = vld [vmem:[#allocation11 + $0xac] ss:$16 sps:$4 sm:$0xff]  }
  0x65   :  { %1210 = vmatprep.subr.bf16.mxu0 %v1646_v18 }
  0x66   :  { %285 = vmatmul.mubr.bf16.gmra.mxu0 %v131_v46  ;;  %v1952_v46 = vrot.slane %v150_v44, %v1943_v43 }
  0x67   :  { %294 = vmatprep.mubr.bf16.mxu0 %v1865_v0  ;;  %594 = vmatpush2.bf16.msra.mxu1 %v1613_v61 }
  0x68   :  { %595 = vmatprep.subr.bf16.mxu1 %v1614_v62  ;;  %1211 = vmatpush1.bf16.msra.mxu0 %v1644_v19 }
  0x69   :  { %1212 = vmatprep.subr.bf16.mxu0 %v1652_v20 }
  0x6b   :  { %596 = vmatpush2.bf16.msra.mxu1 %v1616_v2 }
  0x6c   :  { %597 = vmatprep.subr.bf16.mxu1 %v1617_v4  ;;  %1213 = vmatpush1.bf16.msra.mxu0 %v1650_v21 }
  0x6d   :  { %1214 = vmatprep.subr.bf16.mxu0 %v1658_v22 }
  0x6e   :  { %295 = vmatmul.mubr.bf16.gmra.mxu0 %v132_v57 }
  0x6f   :  { %304 = vmatprep.mubr.bf16.mxu0 %v1865_v0  ;;  %598 = vmatpush2.bf16.msra.mxu1 %v1619_v5  ;;  %v1625_v0 = vld [vmem:[#allocation8 + $0xa0] ss:$8 sps:$4 sm:$0xff]  }
  0x70   :  { %599 = vmatprep.subr.bf16.mxu1 %v1620_v6  ;;  %1215 = vmatpush1.bf16.msra.mxu0 %v1656_v23  ;;  %v1635_v6 = vld [vmem:[#allocation11 + $0xe8] ss:$16 sps:$4 sm:$0xff]  }
  0x71   :  { %1216 = vmatprep.subr.bf16.mxu0 %v1664_v24 }
  0x73   :  { %600 = vmatpush2.bf16.msra.mxu1 %v1622_v7 }
  0x74   :  { %601 = vmatprep.subr.bf16.mxu1 %v1623_v8  ;;  %1217 = vmatpush1.bf16.msra.mxu0 %v1662_v25 }
  0x75   :  { %1218 = vmatprep.subr.bf16.mxu0 %v1670_v26 }
  0x76   :  { %305 = vmatmul.mubr.bf16.gmra.mxu0 %v133_v3 }
  0x77   :  { %602 = vmatpush2.bf16.msra.mxu1 %v1625_v0  ;;  %v1643_v0 = vld [vmem:[#allocation11 + $0xcc] ss:$16 sps:$4 sm:$0xff]  }
  0x78   :  { %603 = vmatprep.subr.bf16.mxu1 %v1626_v9  ;;  %1219 = vmatpush1.bf16.msra.mxu0 %v1668_v27  ;;  %v1647_v27 = vld [vmem:[#allocation11 + $0xa8] ss:$16 sps:$4 sm:$0xff]  }
  0x79   :  { %1220 = vmatprep.subr.bf16.mxu0 %v1676_v28 }
  0x7b   :  { %604 = vmatpush2.bf16.msra.mxu1 %v1628_v10 }
  0x7c   :  { %605 = vmatprep.subr.bf16.mxu1 %v1629_v11  ;;  %1221 = vmatpush1.bf16.msra.mxu0 %v1674_v29 }
  0x7d   :  { %1222 = vmatprep.subr.bf16.mxu0 %v1682_v30  ;;  %v1655_v30 = vld [vmem:[#allocation11 + $0x8c] ss:$16 sps:$4 sm:$0xff]  }
  0x7f   :  { %606 = vmatpush2.bf16.msra.mxu1 %v1631_v12 }
  0x80   :  { %1279 = vmatprep.subr.bf16.mxu1 %v1637_v15  ;;  %1223 = vmatpush2.bf16.msra.mxu0 %v1680_v31  ;;  %v1641_v15 = vld [vmem:[#allocation11 + $0xc8] ss:$16 sps:$4 sm:$0xff]  }
  0x81   :  { %1224 = vmatprep.subr.bf16.mxu0 %v1688_v32 }
  0x84   :  { %1225 = vmatpush2.bf16.msra.mxu0 %v1686_v33 }
  0x85   :  { %1226 = vmatprep.subr.bf16.mxu0 %v1694_v34 }
  0x88   :  { %1227 = vmatpush2.bf16.msra.mxu0 %v1692_v35 }
  0x89   :  { %1228 = vmatprep.subr.bf16.mxu0 %v1700_v36 }
  0x8c   :  { %1229 = vmatpush2.bf16.msra.mxu0 %v1698_v37  ;;  %v1653_v37 = vld [vmem:[#allocation11 + $0x88] ss:$16 sps:$4 sm:$0xff]  }
  0x8d   :  { %1230 = vmatprep.subr.bf16.mxu0 %v1706_v38 }
  0x90   :  { %1231 = vmatpush2.bf16.msra.mxu0 %v1704_v39  ;;  %v1661_v39 = vld [vmem:[#allocation11 + $0x6c] ss:$16 sps:$4 sm:$0xff]  }
 0x11e   :  { %v276_v47 = vpop.f32.mrf.mxu0 }
 0x11f   :  { %v277_v50 = vadd.f32 %v276_v47, %v1952_v46 }
 0x120   :  { %v278_v48 = vpop.f32.mrf.mxu0 }
 0x121   :  { %v279_v49 = vadd.f32 %v278_v48, %v1949_v45  ;;  %v331_v57 = vmul.f32 0.15, %v277_v50  ;;  %vm315_vm10 = vcmp.gt.f32.partialorder %v277_v50, 0.0 }
 0x122   :  { %v280_v51 = vpop.f32.mrf.mxu0 }
 0x123   :  { %v281_v52 = vadd.f32 %v280_v51, %v1952_v46  ;;  %v332_v54 = vmul.f32 0.15, %v279_v49  ;;  %vm316_vm9 = vcmp.gt.f32.partialorder %v279_v49, 0.0  ;;  %v347_v5 = vsel %vm315_vm10, %v277_v50, %v331_v57  ;;  %v1667_v57 = vld [vmem:[#allocation11 + $0x4c] ss:$16 sps:$4 sm:$0xff]  }
 0x124   :  { %v282_v53 = vpop.f32.mrf.mxu0 }
 0x125   :  { %vm317_vm8 = vcmp.gt.f32.partialorder %v281_v52, 0.0  ;;  %v333_v55 = vmul.f32 0.15, %v281_v52  ;;  %v283_v56 = vadd.f32 %v282_v53, %v1949_v45  ;;  %v348_v63 = vsel %vm316_vm9, %v279_v49, %v332_v54  ;;  %v1659_v54 = vld [vmem:[#allocation11 + $0x68] ss:$16 sps:$4 sm:$0xff]  }
 0x126   :  { %v286_v58 = vpop.f32.mrf.mxu0 }
 0x127   :  { %v334_v59 = vmul.f32 0.15, %v283_v56  ;;  %vm318_vm11 = vcmp.gt.f32.partialorder %v283_v56, 0.0  ;;  %v349_v61 = vsel %vm317_vm8, %v281_v52, %v333_v55  ;;  %v287_v2 = vadd.f32 %v286_v58, %v1952_v46 }
 0x128   :  { %v288_v60 = vpop.f32.mrf.mxu0  ;;  %v363_v8 = vpack.c.bf16 %v349_v61, %v347_v5 }
 0x129   :  { %v289_v62 = vadd.f32 %v288_v60, %v1949_v45  ;;  %v350_v1 = vsel %vm318_vm11, %v283_v56, %v334_v59  ;;  %v335_v13 = vmul.f32 0.15, %v287_v2  ;;  %vm319_vm14 = vcmp.gt.f32.partialorder %v287_v2, 0.0 }
 0x12a   :  { %v290_v3 = vpop.f32.mrf.mxu0  ;;  %v364_v4 = vpack.c.bf16 %v350_v1, %v348_v63  ;;  %v1665_v63 = vld [vmem:[#allocation11 + $0x48] ss:$16 sps:$4 sm:$0xff]  }
 0x12b   :  { %v291_v7 = vadd.f32 %v290_v3, %v1952_v46  ;;  %v336_v10 = vmul.f32 0.15, %v289_v62  ;;  %vm320_vm13 = vcmp.gt.f32.partialorder %v289_v62, 0.0  ;;  %v351_v26 = vsel %vm319_vm14, %v287_v2, %v335_v13  ;;  %v1697_v13 = vld [vmem:[#allocation11 + $0x1ac] ss:$16 sps:$4 sm:$0xff]  }
 0x12c   :  { %v292_v9 = vpop.f32.mrf.mxu0  ;;  %607 = vmatprep.mubr.bf16.mxu1 %v364_v4 }
 0x12d   :  { %vm321_vm12 = vcmp.gt.f32.partialorder %v291_v7, 0.0  ;;  %v337_v11 = vmul.f32 0.15, %v291_v7  ;;  %v293_v12 = vadd.f32 %v292_v9, %v1949_v45  ;;  %608 = vmatmul.mubr.bf16.vlgmr.msra.gmra.mxu1 %v363_v8  ;;  %v352_v21 = vsel %vm320_vm13, %v289_v62, %v336_v10  ;;  %v1685_v9 = vld [vmem:[#allocation11 + $0x1ec] ss:$16 sps:$4 sm:$0xff]  }
 0x12e   :  { %v296_v14 = vpop.f32.mrf.mxu0  ;;  %1280 = vmatpush1.bf16.msra.mxu1 %v1635_v6  ;;  %v1683_v10 = vld [vmem:[#allocation11 + $0x1e8] ss:$16 sps:$4 sm:$0xff]  }
 0x12f   :  { %vm322_vm15 = vcmp.gt.f32.partialorder %v293_v12, 0.0  ;;  %v338_v16 = vmul.f32 0.15, %v293_v12  ;;  %1281 = vmatprep.subr.bf16.mxu1 %v1643_v0  ;;  %v353_v19 = vsel %vm321_vm12, %v291_v7, %v337_v11  ;;  %v297_v23 = vadd.f32 %v296_v14, %v1952_v46  ;;  %v1671_v7 = vld [vmem:[#allocation11 + $0x28] ss:$16 sps:$4 sm:$0xff]  }
 0x130   :  { %v298_v18 = vpop.f32.mrf.mxu0  ;;  %v365_v29 = vpack.c.bf16 %v353_v19, %v351_v26  ;;  %v1677_v0 = vld [vmem:[#allocation11 + $0x8] ss:$16 sps:$4 sm:$0xff]   ;;  %v1691_v11 = vld [vmem:[#allocation11 + $0x1cc] ss:$16 sps:$4 sm:$0xff]   ;;  %v1712_v19 = vld [vmem:[#allocation11 + $0x144] ss:$16 sps:$4 sm:$0xff]  }
 0x131   :  { %v299_v20 = vadd.f32 %v298_v18, %v1949_v45  ;;  %v354_v22 = vsel %vm322_vm15, %v293_v12, %v338_v16  ;;  %v339_v35 = vmul.f32 0.15, %v297_v23  ;;  %vm323_vm2 = vcmp.gt.f32.partialorder %v297_v23, 0.0  ;;  %v1689_v12 = vld [vmem:[#allocation11 + $0x1c8] ss:$16 sps:$4 sm:$0xff]   ;;  %1232 = vmatprep.subr.bf16.mxu0 %v1712_v19 }
 0x132   :  { %v300_v24 = vpop.f32.mrf.mxu0  ;;  %v366_v25 = vpack.c.bf16 %v354_v22, %v352_v21  ;;  %1282 = vmatpush1.bf16.msra.mxu1 %v1641_v15  ;;  %v1695_v14 = vld [vmem:[#allocation11 + $0x1a8] ss:$16 sps:$4 sm:$0xff]   ;;  %v1703_v15 = vld [vmem:[#allocation11 + $0x18c] ss:$16 sps:$4 sm:$0xff]   ;;  %v1710_v21 = vld [vmem:[#allocation11 + $0x140] ss:$16 sps:$4 sm:$0xff]  }
 0x133   :  { %v301_v28 = vadd.f32 %v300_v24, %v1952_v46  ;;  %1283 = vmatprep.subr.bf16.mxu1 %v1649_v17  ;;  %v340_v32 = vmul.f32 0.15, %v299_v20  ;;  %vm324_vm1 = vcmp.gt.f32.partialorder %v299_v20, 0.0  ;;  %v355_v53 = vsel %vm323_vm2, %v297_v23, %v339_v35  ;;  %v1701_v16 = vld [vmem:[#allocation11 + $0x188] ss:$16 sps:$4 sm:$0xff]   ;;  %1233 = vmatpush2.bf16.msra.mxu0 %v1710_v21 }
 0x134   :  { %v302_v31 = vpop.f32.mrf.mxu0  ;;  %617 = vmatprep.mubr.bf16.mxu1 %v366_v25  ;;  %v1709_v17 = vld [vmem:[#allocation11 + $0x16c] ss:$16 sps:$4 sm:$0xff]   ;;  %v1707_v18 = vld [vmem:[#allocation11 + $0x168] ss:$16 sps:$4 sm:$0xff]   ;;  %v1718_v23 = vld [vmem:[#allocation11 + $0x124] ss:$16 sps:$4 sm:$0xff]  }
 0x135   :  { %vm325_vm0 = vcmp.gt.f32.partialorder %v301_v28, 0.0  ;;  %v341_v33 = vmul.f32 0.15, %v301_v28  ;;  %v303_v34 = vadd.f32 %v302_v31, %v1949_v45  ;;  %618 = vmatmul.mubr.bf16.gmra.mxu1 %v365_v29  ;;  %v356_v48 = vsel %vm324_vm1, %v299_v20, %v340_v32  ;;  %v1715_v20 = vld [vmem:[#allocation11 + $0x14c] ss:$16 sps:$4 sm:$0xff]   ;;  %1234 = vmatprep.subr.bf16.mxu0 %v1718_v23 }
 0x136   :  { %v306_v36 = vpop.f32.mrf.mxu0  ;;  %1284 = vmatpush1.bf16.msra.mxu1 %v1647_v27  ;;  %v1713_v22 = vld [vmem:[#allocation11 + $0x148] ss:$16 sps:$4 sm:$0xff]   ;;  %v1721_v24 = vld [vmem:[#allocation11 + $0x12c] ss:$16 sps:$4 sm:$0xff]   ;;  %v1716_v25 = vld [vmem:[#allocation11 + $0x120] ss:$16 sps:$4 sm:$0xff]  }
 0x137   :  { %vm326_vm3 = vcmp.gt.f32.partialorder %v303_v34, 0.0  ;;  %v342_v38 = vmul.f32 0.15, %v303_v34  ;;  %1285 = vmatprep.subr.bf16.mxu1 %v1655_v30  ;;  %v357_v44 = vsel %vm325_vm0, %v301_v28, %v341_v33  ;;  %v307_v50 = vadd.f32 %v306_v36, %v1952_v46  ;;  %v1719_v26 = vld [vmem:[#allocation11 + $0x128] ss:$16 sps:$4 sm:$0xff]   ;;  %1235 = vmatpush2.bf16.msra.mxu0 %v1716_v25 }
 0x138   :  { %v308_v40 = vpop.f32.mrf.mxu0  ;;  %v367_v56 = vpack.c.bf16 %v357_v44, %v355_v53  ;;  %v1724_v27 = vld [vmem:[#allocation11 + $0x104] ss:$16 sps:$4 sm:$0xff]   ;;  %v1727_v28 = vld [vmem:[#allocation11 + $0x10c] ss:$16 sps:$4 sm:$0xff]   ;;  %v1722_v29 = vld [vmem:[#allocation11 + $0x100] ss:$16 sps:$4 sm:$0xff]  }
 0x139   :  { %v309_v47 = vadd.f32 %v308_v40, %v1949_v45  ;;  %v358_v49 = vsel %vm326_vm3, %v303_v34, %v342_v38  ;;  %v343_v62 = vmul.f32 0.15, %v307_v50  ;;  %vm327_vm6 = vcmp.gt.f32.partialorder %v307_v50, 0.0  ;;  %v1725_v30 = vld [vmem:[#allocation11 + $0x108] ss:$16 sps:$4 sm:$0xff]   ;;  %1236 = vmatprep.subr.bf16.mxu0 %v1724_v27 }
 0x13a   :  { %v310_v51 = vpop.f32.mrf.mxu0  ;;  %v368_v52 = vpack.c.bf16 %v358_v49, %v356_v48  ;;  %1286 = vmatpush1.bf16.msra.mxu1 %v1653_v37  ;;  %v403_v31 = vld [vmem:[#allocation9] sm:$0x3] }
 0x13b   :  { %v311_v55 = vadd.f32 %v310_v51, %v1952_v46  ;;  %1287 = vmatprep.subr.bf16.mxu1 %v1661_v39  ;;  %v344_v59 = vmul.f32 0.15, %v309_v47  ;;  %vm328_vm5 = vcmp.gt.f32.partialorder %v309_v47, 0.0  ;;  %v1673_v46 = vld [vmem:[#allocation11 + $0x2c] ss:$16 sps:$4 sm:$0xff]   ;;  %v359_v6 = vsel %vm327_vm6, %v307_v50, %v343_v62  ;;  %1237 = vmatpush2.bf16.msra.mxu0 %v1722_v29 }
 0x13c   :  { %v312_v58 = vpop.f32.mrf.mxu0  ;;  %627 = vmatprep.mubr.bf16.mxu1 %v368_v52  ;;  %v1971_v32 = vrot.slane %v403_v31, %v1940_v42  ;;  %v1974_v33 = vrot.slane %v403_v31, %v1943_v43 }
 0x13d   :  { %vm329_vm4 = vcmp.gt.f32.partialorder %v311_v55, 0.0  ;;  %v345_v60 = vmul.f32 0.15, %v311_v55  ;;  %v313_v61 = vadd.f32 %v312_v58, %v1949_v45  ;;  %628 = vmatmul.mubr.bf16.gmra.mxu1 %v367_v56  ;;  %v360_v3 = vsel %vm328_vm5, %v309_v47, %v344_v59  ;;  %v1679_v45 = vld [vmem:[#allocation11 + $0xc] ss:$16 sps:$4 sm:$0xff]  }
 0x13e   :  { %1288 = vmatpush1.bf16.msra.mxu1 %v1659_v54 }
 0x13f   :  { %vm330_vm7 = vcmp.gt.f32.partialorder %v313_v61, 0.0  ;;  %v346_v1 = vmul.f32 0.15, %v313_v61  ;;  %1289 = vmatprep.subr.bf16.mxu1 %v1667_v57  ;;  %v361_v2 = vsel %vm329_vm4, %v311_v55, %v345_v60 }
 0x140   :  { %v369_v8 = vpack.c.bf16 %v361_v2, %v359_v6 }
 0x141   :  { %v362_v4 = vsel %vm330_vm7, %v313_v61, %v346_v1 }
 0x142   :  { %v370_v5 = vpack.c.bf16 %v362_v4, %v360_v3  ;;  %1290 = vmatpush1.bf16.msra.mxu1 %v1665_v63 }
 0x143   :  { %1291 = vmatprep.subr.bf16.mxu1 %v1673_v46 }
 0x144   :  { %637 = vmatprep.mubr.bf16.mxu1 %v370_v5 }
 0x145   :  { %638 = vmatmul.mubr.bf16.gmra.mxu1 %v369_v8 }
 0x146   :  { %1292 = vmatpush1.bf16.msra.mxu1 %v1671_v7 }
 0x147   :  { %1293 = vmatprep.subr.bf16.mxu1 %v1679_v45 }
 0x14a   :  { %1294 = vmatpush1.bf16.msra.mxu1 %v1677_v0 }
 0x14b   :  { %1295 = vmatprep.subr.bf16.mxu1 %v1685_v9 }
 0x14e   :  { %1296 = vmatpush2.bf16.msra.mxu1 %v1683_v10 }
 0x14f   :  { %1297 = vmatprep.subr.bf16.mxu1 %v1691_v11 }
 0x152   :  { %1298 = vmatpush2.bf16.msra.mxu1 %v1689_v12 }
 0x153   :  { %1299 = vmatprep.subr.bf16.mxu1 %v1697_v13 }
 0x156   :  { %1300 = vmatpush2.bf16.msra.mxu1 %v1695_v14 }
 0x157   :  { %1301 = vmatprep.subr.bf16.mxu1 %v1703_v15 }
 0x15a   :  { %1302 = vmatpush2.bf16.msra.mxu1 %v1701_v16 }
 0x15b   :  { %1303 = vmatprep.subr.bf16.mxu1 %v1709_v17 }
 0x15e   :  { %1304 = vmatpush2.bf16.msra.mxu1 %v1707_v18 }
 0x15f   :  { %1305 = vmatprep.subr.bf16.mxu1 %v1715_v20 }
 0x162   :  { %1306 = vmatpush2.bf16.msra.mxu1 %v1713_v22 }
 0x163   :  { %1307 = vmatprep.subr.bf16.mxu1 %v1721_v24 }
 0x166   :  { %1308 = vmatpush2.bf16.msra.mxu1 %v1719_v26 }
 0x167   :  { %1309 = vmatprep.subr.bf16.mxu1 %v1727_v28 }
 0x16a   :  { %1310 = vmatpush2.bf16.msra.mxu1 %v1725_v30 }
 0x1ed   :  { %v609_v34 = vpop.f32.mrf.mxu1 }
 0x1ee   :  { %v610_v37 = vadd.f32 %v609_v34, %v1974_v33 }
 0x1ef   :  { %v611_v35 = vpop.f32.mrf.mxu1 }
 0x1f0   :  { %v612_v36 = vadd.f32 %v611_v35, %v1971_v32  ;;  %v664_v49 = vmul.f32 0.15, %v610_v37  ;;  %vm648_vm10 = vcmp.gt.f32.partialorder %v610_v37, 0.0 }
 0x1f1   :  { %v613_v38 = vpop.f32.mrf.mxu1 }
 0x1f2   :  { %v614_v39 = vadd.f32 %v613_v38, %v1974_v33  ;;  %v665_v44 = vmul.f32 0.15, %v612_v36  ;;  %vm649_vm9 = vcmp.gt.f32.partialorder %v612_v36, 0.0  ;;  %v680_v57 = vsel %vm648_vm10, %v610_v37, %v664_v49 }
 0x1f3   :  { %v615_v40 = vpop.f32.mrf.mxu1 }
 0x1f4   :  { %vm650_vm8 = vcmp.gt.f32.partialorder %v614_v39, 0.0  ;;  %v666_v47 = vmul.f32 0.15, %v614_v39  ;;  %v616_v48 = vadd.f32 %v615_v40, %v1971_v32  ;;  %v681_v55 = vsel %vm649_vm9, %v612_v36, %v665_v44 }
 0x1f5   :  { %v619_v50 = vpop.f32.mrf.mxu1 }
 0x1f6   :  { %vm651_vm11 = vcmp.gt.f32.partialorder %v616_v48, 0.0  ;;  %v667_v51 = vmul.f32 0.15, %v616_v48  ;;  %v682_v52 = vsel %vm650_vm8, %v614_v39, %v666_v47  ;;  %v620_v58 = vadd.f32 %v619_v50, %v1974_v33 }
 0x1f7   :  { %v621_v53 = vpop.f32.mrf.mxu1  ;;  %v1539_v61 = vpack.c.bf16 %v682_v52, %v680_v57  ;;  %v840_v52 = vsub.s32 3, %v1937_v41 }
 0x1f8   :  { %v622_v54 = vadd.f32 %v621_v53, %v1971_v32  ;;  %v683_v56 = vsel %vm651_vm11, %v616_v48, %v667_v51  ;;  %v668_v3 = vmul.f32 0.15, %v620_v58  ;;  %vm652_vm14 = vcmp.gt.f32.partialorder %v620_v58, 0.0 }
 0x1f9   :  { %v623_v59 = vpop.f32.mrf.mxu1  ;;  %v1540_v60 = vpack.c.bf16 %v683_v56, %v681_v55  ;;  %v836_v51 = vsub.s32 2, %v1937_v41 }
 0x1fa   :  { %v624_v62 = vadd.f32 %v623_v59, %v1974_v33  ;;  %v669_v1 = vmul.f32 0.15, %v622_v54  ;;  %vm653_vm13 = vcmp.gt.f32.partialorder %v622_v54, 0.0  ;;  %v684_v12 = vsel %vm652_vm14, %v620_v58, %v668_v3 }
 0x1fb   :  { %v625_v63 = vpop.f32.mrf.mxu1  ;;  %1238 = vmatprep.mubr.bf16.mxu0 %v1540_v60  ;;  %1311 = vmatprep.mubr.bf16.mxu1 %v1540_v60 }
 0x1fc   :  { %vm654_vm12 = vcmp.gt.f32.partialorder %v624_v62, 0.0  ;;  %v670_v46 = vmul.f32 0.15, %v624_v62  ;;  %v626_v2 = vadd.f32 %v625_v63, %v1971_v32  ;;  %1239 = vmatmul.mubr.bf16.vlgmr.msra.gmra.mxu0 %v1539_v61  ;;  %1312 = vmatmul.mubr.bf16.vlgmr.msra.gmra.mxu1 %v1539_v61  ;;  %v685_v45 = vsel %vm653_vm13, %v622_v54, %v669_v1 }
 0x1fd   :  { %v629_v4 = vpop.f32.mrf.mxu1 }
 0x1fe   :  { %vm655_vm15 = vcmp.gt.f32.partialorder %v626_v2, 0.0  ;;  %v671_v5 = vmul.f32 0.15, %v626_v2  ;;  %v686_v7 = vsel %vm654_vm12, %v624_v62, %v670_v46  ;;  %v630_v9 = vadd.f32 %v629_v4, %v1974_v33 }
 0x1ff   :  { %v631_v6 = vpop.f32.mrf.mxu1  ;;  %v1541_v14 = vpack.c.bf16 %v686_v7, %v684_v12 }
 0x200   :  { %v632_v8 = vadd.f32 %v631_v6, %v1971_v32  ;;  %v687_v0 = vsel %vm655_vm15, %v626_v2, %v671_v5  ;;  %v672_v19 = vmul.f32 0.15, %v630_v9  ;;  %vm656_vm2 = vcmp.gt.f32.partialorder %v630_v9, 0.0 }
 0x201   :  { %v633_v10 = vpop.f32.mrf.mxu1  ;;  %v1542_v11 = vpack.c.bf16 %v687_v0, %v685_v45 }
 0x202   :  { %v634_v13 = vadd.f32 %v633_v10, %v1974_v33  ;;  %v673_v16 = vmul.f32 0.15, %v632_v8  ;;  %vm657_vm1 = vcmp.gt.f32.partialorder %v632_v8, 0.0  ;;  %v688_v30 = vsel %vm656_vm2, %v630_v9, %v672_v19 }
 0x203   :  { %v635_v15 = vpop.f32.mrf.mxu1  ;;  %1248 = vmatprep.mubr.bf16.mxu0 %v1542_v11  ;;  %1321 = vmatprep.mubr.bf16.mxu1 %v1542_v11 }
 0x204   :  { %vm658_vm0 = vcmp.gt.f32.partialorder %v634_v13, 0.0  ;;  %v674_v17 = vmul.f32 0.15, %v634_v13  ;;  %v636_v18 = vadd.f32 %v635_v15, %v1971_v32  ;;  %1249 = vmatmul.mubr.bf16.gmra.mxu0 %v1541_v14  ;;  %1322 = vmatmul.mubr.bf16.gmra.mxu1 %v1541_v14  ;;  %v689_v25 = vsel %vm657_vm1, %v632_v8, %v673_v16 }
 0x205   :  { %v639_v20 = vpop.f32.mrf.mxu1 }
 0x206   :  { %vm659_vm3 = vcmp.gt.f32.partialorder %v636_v18, 0.0  ;;  %v675_v21 = vmul.f32 0.15, %v636_v18  ;;  %v690_v23 = vsel %vm658_vm0, %v634_v13, %v674_v17  ;;  %v640_v27 = vadd.f32 %v639_v20, %v1974_v33 }
 0x207   :  { %v641_v22 = vpop.f32.mrf.mxu1  ;;  %v1543_v34 = vpack.c.bf16 %v690_v23, %v688_v30 }
 0x208   :  { %v642_v24 = vadd.f32 %v641_v22, %v1971_v32  ;;  %v691_v26 = vsel %vm659_vm3, %v636_v18, %v675_v21  ;;  %v676_v39 = vmul.f32 0.15, %v640_v27  ;;  %vm660_vm6 = vcmp.gt.f32.partialorder %v640_v27, 0.0 }
 0x209   :  { %v643_v28 = vpop.f32.mrf.mxu1  ;;  %v1544_v29 = vpack.c.bf16 %v691_v26, %v689_v25 }
 0x20a   :  { %v644_v31 = vadd.f32 %v643_v28, %v1974_v33  ;;  %v677_v36 = vmul.f32 0.15, %v642_v24  ;;  %vm661_vm5 = vcmp.gt.f32.partialorder %v642_v24, 0.0  ;;  %v692_v49 = vsel %vm660_vm6, %v640_v27, %v676_v39 }
 0x20b   :  { %v645_v35 = vpop.f32.mrf.mxu1  ;;  %1258 = vmatprep.mubr.bf16.mxu0 %v1544_v29  ;;  %1331 = vmatprep.mubr.bf16.mxu1 %v1544_v29 }
 0x20c   :  { %vm662_vm4 = vcmp.gt.f32.partialorder %v644_v31, 0.0  ;;  %v678_v37 = vmul.f32 0.15, %v644_v31  ;;  %v646_v38 = vadd.f32 %v645_v35, %v1971_v32  ;;  %1259 = vmatmul.mubr.bf16.gmra.mxu0 %v1543_v34  ;;  %1332 = vmatmul.mubr.bf16.gmra.mxu1 %v1543_v34  ;;  %v693_v47 = vsel %vm661_vm5, %v642_v24, %v677_v36  ;;  %v824_v32 = vld [vmem:[%s2048_s6] sm:$0xf]  ;;  %s1866_s6 = smov [#allocation12]  }
 0x20d   :  { %v1998_v53 = vrot.slane %v824_v32, %v1943_v43  ;;  %v2000_v54 = vrot.slane %v824_v32, %v836_v51  ;;  %v2003_v55 = vrot.slane %v824_v32, %v1940_v42  ;;  %v2005_v56 = vrot.slane %v824_v32, %v840_v52  ;;  %s1389_s28 = sshll.u32 %s1866_s6, 4  ;;  %s1390_s28 = int_to_ptr.vmem [resolvable:$true] %s1389_s28 }
 0x20e   :  { %vm663_vm7 = vcmp.gt.f32.partialorder %v646_v38, 0.0  ;;  %v679_v40 = vmul.f32 0.15, %v646_v38  ;;  %v694_v44 = vsel %vm662_vm4, %v644_v31, %v678_v37  ;;  %s1828_s29 = scalar_lea.vmem %s1390_s28, 4096  ;;  %p1833_p12 = scmp.lt.s32.totalorder %s1390_s28, %s1390_s28 }
 0x20f   :  { %v1545_v50 = vpack.c.bf16 %v694_v44, %v692_v49  ;;  %p1829_p11 = scmp.ne.s32.totalorder %s1390_s28, %s1828_s29  ;;  %p1834_p13 = scmp.lt.s32.totalorder %s1828_s29, %s1828_s29 }
 0x210   :  { %v695_v48 = vsel %vm663_vm7, %v646_v38, %v679_v40 }
 0x211   :  { %v1546_v33 = vpack.c.bf16 %v695_v48, %v693_v47  ;;  %p1835_p0 = por %p1834_p13, %p1833_p12 }
 0x213   :  { %1268 = vmatprep.mubr.bf16.mxu0 %v1546_v33  ;;  %1341 = vmatprep.mubr.bf16.mxu1 %v1546_v33  ;;  %p1836_p1 = pnand %p1835_p0, %p1829_p11 }
 0x214   :  { %1269 = vmatmul.mubr.bf16.gmra.mxu0 %v1545_v50  ;;  %1342 = vmatmul.mubr.bf16.gmra.mxu1 %v1545_v50 }
 0x2bc   :  { %v1240_v57 = vpop.f32.mrf.mxu0  ;;  %v1313_v58 = vpop.f32.mrf.mxu1 }
 0x2bd   :  { %v1241_v59 = vadd.f32 %v1240_v57, %v1998_v53  ;;  %v1314_v60 = vadd.f32 %v1313_v58, %v2000_v54 }
 0x2be   :  { %v1242_v61 = vpop.f32.mrf.mxu0  ;;  %v1315_v62 = vpop.f32.mrf.mxu1 }
 0x2bf   :  { %1352 = vst [vmem:[#allocation12] sm:$0xff] %v1241_v59  ;;  %1354 = vst [vmem:[#allocation12 + $0x10] sm:$0xff] %v1314_v60  ;;  %v1243_v41 = vadd.f32 %v1242_v61, %v2003_v55  ;;  %v1316_v43 = vadd.f32 %v1315_v62, %v2005_v56 }
 0x2c0   :  { %v1244_v63 = vpop.f32.mrf.mxu0  ;;  %v1317_v1 = vpop.f32.mrf.mxu1 }
 0x2c1   :  { %1353 = vst [vmem:[#allocation12 + $0x8] sm:$0xff] %v1243_v41  ;;  %1355 = vst [vmem:[#allocation12 + $0x18] sm:$0xff] %v1316_v43  ;;  %v1245_v42 = vadd.f32 %v1244_v63, %v1998_v53  ;;  %v1318_v46 = vadd.f32 %v1317_v1, %v2000_v54 }
 0x2c2   :  { %v1246_v2 = vpop.f32.mrf.mxu0  ;;  %v1319_v3 = vpop.f32.mrf.mxu1 }
 0x2c3   :  { %1356 = vst [vmem:[#allocation12 + $0x20] sm:$0xff] %v1245_v42  ;;  %1358 = vst [vmem:[#allocation12 + $0x30] sm:$0xff] %v1318_v46  ;;  %v1247_v4 = vadd.f32 %v1246_v2, %v2003_v55  ;;  %v1320_v5 = vadd.f32 %v1319_v3, %v2005_v56 }
 0x2c4   :  { %v1250_v6 = vpop.f32.mrf.mxu0  ;;  %v1323_v7 = vpop.f32.mrf.mxu1 }
 0x2c5   :  { %1357 = vst [vmem:[#allocation12 + $0x28] sm:$0xff] %v1247_v4  ;;  %1359 = vst [vmem:[#allocation12 + $0x38] sm:$0xff] %v1320_v5  ;;  %v1251_v8 = vadd.f32 %v1250_v6, %v1998_v53  ;;  %v1324_v45 = vadd.f32 %v1323_v7, %v2000_v54 }
 0x2c6   :  { %v1252_v0 = vpop.f32.mrf.mxu0  ;;  %v1325_v9 = vpop.f32.mrf.mxu1 }
 0x2c7   :  { %1360 = vst [vmem:[#allocation12 + $0x40] sm:$0xff] %v1251_v8  ;;  %1362 = vst [vmem:[#allocation12 + $0x50] sm:$0xff] %v1324_v45  ;;  %v1253_v10 = vadd.f32 %v1252_v0, %v2003_v55  ;;  %v1326_v11 = vadd.f32 %v1325_v9, %v2005_v56 }
 0x2c8   :  { %v1254_v12 = vpop.f32.mrf.mxu0  ;;  %v1327_v13 = vpop.f32.mrf.mxu1 }
 0x2c9   :  { %1361 = vst [vmem:[#allocation12 + $0x48] sm:$0xff] %v1253_v10  ;;  %1363 = vst [vmem:[#allocation12 + $0x58] sm:$0xff] %v1326_v11  ;;  %v1255_v14 = vadd.f32 %v1254_v12, %v1998_v53  ;;  %v1328_v15 = vadd.f32 %v1327_v13, %v2000_v54 }
 0x2ca   :  { %v1256_v16 = vpop.f32.mrf.mxu0  ;;  %v1329_v17 = vpop.f32.mrf.mxu1 }
 0x2cb   :  { %1364 = vst [vmem:[#allocation12 + $0x60] sm:$0xff] %v1255_v14  ;;  %1366 = vst [vmem:[#allocation12 + $0x70] sm:$0xff] %v1328_v15  ;;  %v1257_v18 = vadd.f32 %v1256_v16, %v2003_v55  ;;  %v1330_v19 = vadd.f32 %v1329_v17, %v2005_v56 }
 0x2cc   :  { %v1260_v20 = vpop.f32.mrf.mxu0  ;;  %v1333_v21 = vpop.f32.mrf.mxu1 }
 0x2cd   :  { %1365 = vst [vmem:[#allocation12 + $0x68] sm:$0xff] %v1257_v18  ;;  %1367 = vst [vmem:[#allocation12 + $0x78] sm:$0xff] %v1330_v19  ;;  %v1261_v22 = vadd.f32 %v1260_v20, %v1998_v53  ;;  %v1334_v23 = vadd.f32 %v1333_v21, %v2000_v54 }
 0x2ce   :  { %v1262_v24 = vpop.f32.mrf.mxu0  ;;  %v1335_v25 = vpop.f32.mrf.mxu1 }
 0x2cf   :  { %1368 = vst [vmem:[#allocation12 + $0x80] sm:$0xff] %v1261_v22  ;;  %1370 = vst [vmem:[#allocation12 + $0x90] sm:$0xff] %v1334_v23  ;;  %v1263_v26 = vadd.f32 %v1262_v24, %v2003_v55  ;;  %v1336_v27 = vadd.f32 %v1335_v25, %v2005_v56 }
 0x2d0   :  { %v1264_v28 = vpop.f32.mrf.mxu0  ;;  %v1337_v29 = vpop.f32.mrf.mxu1 }
 0x2d1   :  { %1369 = vst [vmem:[#allocation12 + $0x88] sm:$0xff] %v1263_v26  ;;  %1371 = vst [vmem:[#allocation12 + $0x98] sm:$0xff] %v1336_v27  ;;  %v1265_v30 = vadd.f32 %v1264_v28, %v1998_v53  ;;  %v1338_v31 = vadd.f32 %v1337_v29, %v2000_v54 }
 0x2d2   :  { %v1266_v34 = vpop.f32.mrf.mxu0  ;;  %v1339_v35 = vpop.f32.mrf.mxu1 }
 0x2d3   :  { %1372 = vst [vmem:[#allocation12 + $0xa0] sm:$0xff] %v1265_v30  ;;  %1374 = vst [vmem:[#allocation12 + $0xb0] sm:$0xff] %v1338_v31  ;;  %v1267_v36 = vadd.f32 %v1266_v34, %v2003_v55  ;;  %v1340_v37 = vadd.f32 %v1339_v35, %v2005_v56 }
 0x2d4   :  { %v1270_v38 = vpop.f32.mrf.mxu0  ;;  %v1343_v39 = vpop.f32.mrf.mxu1 }
 0x2d5   :  { %1373 = vst [vmem:[#allocation12 + $0xa8] sm:$0xff] %v1267_v36  ;;  %1375 = vst [vmem:[#allocation12 + $0xb8] sm:$0xff] %v1340_v37  ;;  %v1271_v40 = vadd.f32 %v1270_v38, %v1998_v53  ;;  %v1344_v44 = vadd.f32 %v1343_v39, %v2000_v54 }
 0x2d6   :  { %v1272_v47 = vpop.f32.mrf.mxu0  ;;  %v1345_v48 = vpop.f32.mrf.mxu1 }
 0x2d7   :  { %1376 = vst [vmem:[#allocation12 + $0xc0] sm:$0xff] %v1271_v40  ;;  %1378 = vst [vmem:[#allocation12 + $0xd0] sm:$0xff] %v1344_v44  ;;  %v1273_v33 = vadd.f32 %v1272_v47, %v2003_v55  ;;  %v1346_v49 = vadd.f32 %v1345_v48, %v2005_v56 }
 0x2d8   :  { %v1274_v50 = vpop.f32.mrf.mxu0  ;;  %v1347_v51 = vpop.f32.mrf.mxu1 }
 0x2d9   :  { %1377 = vst [vmem:[#allocation12 + $0xc8] sm:$0xff] %v1273_v33  ;;  %1379 = vst [vmem:[#allocation12 + $0xd8] sm:$0xff] %v1346_v49  ;;  %v1275_v32 = vadd.f32 %v1274_v50, %v1998_v53  ;;  %v1348_v52 = vadd.f32 %v1347_v51, %v2000_v54 }
 0x2da   :  { %v1276_v57 = vpop.f32.mrf.mxu0  ;;  %v1349_v58 = vpop.f32.mrf.mxu1 }
 0x2db   :  { %1380 = vst [vmem:[#allocation12 + $0xe0] sm:$0xff] %v1275_v32  ;;  %1382 = vst [vmem:[#allocation12 + $0xf0] sm:$0xff] %v1348_v52  ;;  %v1277_v59 = vadd.f32 %v1276_v57, %v2003_v55  ;;  %v1350_v60 = vadd.f32 %v1349_v58, %v2005_v56 }
 0x2dd   :  { %1381 = vst [vmem:[#allocation12 + $0xe8] sm:$0xff] %v1277_v59  ;;  %1383 = vst [vmem:[#allocation12 + $0xf8] sm:$0xff] %v1350_v60 }
 0x2de   :  { %1839 = shalt.err (!%p1836_p1)
}
 0x2df   :  { %s1867_s30 = smov 512   ;;  %s1868_s8 = smov 32  }
 0x2e0   :  { %1395 = dma.vmem_to_hbm [thread:$0]  %s1390_s28, 4096, %s2049_s7, [#allocation5], %s1867_s30, %s1867_s30, %s1868_s8  }
 0x2e1   :  { %1854 = dma.done.wait [#allocation5], 4096  }
 0x2e2   :  { %1855 = vsyncadd [#allocation5], 4294963200 }
 0x2e3   :  { %1399 = vsyncpa [#allocation4], 1 }
 0x2e4   :  { %1400 = vsyncpa [#allocation7], 1 }
 0x2e5   :  { %1401 = vsyncpa [#allocation10], 1 }
 0x2e6   :  { %1402 = vsyncpa [#allocation5], 1 }

</bundles_post_ra>
